<compile_context>
chip_gen: v7x
topology: tpu7x:2x2x1
jax: 0.10.0
libtpu: 0.0.40
codegen_flags: <defaults>
</compile_context>

<pallas_src>
import functools

import jax
import jax.numpy as jnp
from jax.experimental import pallas as pl
from jax.experimental.pallas import tpu as pltpu

# ----------------------------- model dims (small) -----------------------------
VOCAB_DIM = 128
EMBED_DIM = 16
HIDDEN_DIM = 32
LAYER_DIM = 2
BATCH = 2
SEQ = 8


# ----------------------------------- kernel -----------------------------------
def _lstm_lm_kernel(nlayers, B, T, H, V,
                    tok_ref, w_ref, bias_ref, w_fc_ref, b_fc_ref, out_ref):
    """Inputs:
        tok_ref : (N, 1) int32, time-major (row = t*B + b)
        w_ref   : (V + (2*nlayers - 1)*H, 4H) packed weights, rows:
                    [0:V]                       -> W0 = embedding @ w_ih_0 (folded)
                    [V + (l-1)*H : V + l*H]     -> w_ih_l           (l = 1..L-1)
                    [V + (L-1)*H + l*H : +H]    -> w_hh_l           (l = 0..L-1)
                  gate columns ordered (i, f, o, g)
        bias_ref: (L, 1, 4H)  b_ih + b_hh per layer, gate-reordered
        w_fc_ref: (H, V)
        b_fc_ref: (1, V)
        out_ref : (N, V) time-major logits
    """
    N = B * T

    # ---- fused embedding + layer-0 input projection: one-hot @ (emb @ w_ih_0) ----
    tok = tok_ref[...]                                                    # (N, 1) int32
    onehot = (tok == jax.lax.broadcasted_iota(jnp.int32, (N, V), 1)).astype(jnp.float32)

    whh_base = V + (nlayers - 1) * H
    x = onehot                                                            # layer-0 "input"
    for l in range(nlayers):
        if l == 0:
            w_in = w_ref[0:V, :]                                          # (V, 4H) folded
        else:
            w_in = w_ref[V + (l - 1) * H:V + l * H, :]                    # (H, 4H)
        w_hh = w_ref[whh_base + l * H:whh_base + (l + 1) * H, :]          # (H, 4H)
        bias = bias_ref[l]                                                # (1, 4H)

        # Hoisted input projection: ONE dense matmul per layer, off the recurrence chain.
        gates_x = jnp.dot(x, w_in, preferred_element_type=jnp.float32) + bias   # (N, 4H)

        # h0 = c0 = 0 (matches the PyTorch forward).  Carried as values (vregs).
        h = jnp.zeros((B, H), jnp.float32)
        c = jnp.zeros((B, H), jnp.float32)
        hs = []
        for t in range(T):
            gates = gates_x[t * B:(t + 1) * B, :] + jnp.dot(
                h, w_hh, preferred_element_type=jnp.float32)              # (B, 4H)
            sig = jax.nn.sigmoid(gates[:, :3 * H])                        # i, f, o
            g_g = jnp.tanh(gates[:, 3 * H:])                              # g
            i_g = sig[:, 0:H]
            f_g = sig[:, H:2 * H]
            o_g = sig[:, 2 * H:3 * H]
            c = f_g * c + i_g * g_g
            h = o_g * jnp.tanh(c)
            hs.append(h)

        # Next layer's input / FC input: time-major (row = t*B + b), kept as values.
        x = jnp.concatenate(hs, axis=0)                                   # (N, H)

    # ---- final FC on the time-major slab: (N, H) @ (H, V) + (1, V), lane-dense store ----
    out_ref[...] = (
        jnp.dot(x, w_fc_ref[...], preferred_element_type=jnp.float32) + b_fc_ref[...]
    )


def _full_spec(shape):
    return pl.BlockSpec(shape, lambda i, _n=len(shape): (0,) * _n)


def _reorder_gates(w):
    """Permute the last (4H) dim from PyTorch (i, f, g, o) to (i, f, o, g)."""
    i, f, g, o = jnp.split(w, 4, axis=-1)
    return jnp.concatenate([i, f, o, g], axis=-1)


# ---------------------------------- wrapper -----------------------------------
def language_rnn_forward(x_tokens, params):
    """x_tokens: (B, T) int32 token ids -> (B*T, VOCAB_DIM) float32 logits."""
    B, T = x_tokens.shape
    H, V = HIDDEN_DIM, VOCAB_DIM
    N = B * T

    # Time-major flat token ids (row = t*B + b): each timestep's slice of the hoisted
    # input projection is a contiguous (B, 4H) block.
    tok_tm = x_tokens.T.reshape(N, 1).astype(jnp.int32)

    # Fold the embedding table into the layer-0 input weights: (V, E) @ (E, 4H) -> (V, 4H).
    w0 = params["embedding"] @ _reorder_gates(params["w_ih_0"].T)

    # Pack all (*, 4H) weights into one array (row offsets are sublane-8-aligned).
    w_rows = [w0]
    for l in range(1, LAYER_DIM):
        w_rows.append(_reorder_gates(params[f"w_ih_{l}"].T))              # (H, 4H)
    for l in range(LAYER_DIM):
        w_rows.append(_reorder_gates(params[f"w_hh_{l}"].T))              # (H, 4H)
    w_pack = jnp.concatenate(w_rows, axis=0)                              # (V + 3H, 4H)

    bias_stk = jnp.stack(
        [_reorder_gates(params[f"b_ih_{l}"] + params[f"b_hh_{l}"]) for l in range(LAYER_DIM)],
        axis=0)                                                           # (L, 1, 4H)

    inputs = [tok_tm, w_pack, bias_stk, params["w_fc"].T, params["b_fc"]]
    in_specs = [_full_spec(a.shape) for a in inputs]

    kernel = functools.partial(_lstm_lm_kernel, LAYER_DIM, B, T, H, V)

    out_tm = pl.pallas_call(
        kernel,
        out_shape=jax.ShapeDtypeStruct((N, V), jnp.float32),
        grid=(1,),
        in_specs=in_specs,
        out_specs=pl.BlockSpec((N, V), lambda i: (0, 0)),
        compiler_params=pltpu.CompilerParams(
            dimension_semantics=("arbitrary",)
        ),
    )(*inputs)

    # Time-major (row = t*B + b) -> batch-major (row = b*T + t), trivial XLA reorder.
    return out_tm.reshape(T, B, V).transpose(1, 0, 2).reshape(N, V)


# ----------------------------- pure-JAX reference ------------------------------
def language_rnn_reference(x_tokens, params):
    emb = jnp.take(params["embedding"], x_tokens, axis=0)
    B, T, _ = emb.shape
    H = HIDDEN_DIM
    seq = emb
    for l in range(LAYER_DIM):
        w_ih = params[f"w_ih_{l}"]
        w_hh = params[f"w_hh_{l}"]
        bias = params[f"b_ih_{l}"] + params[f"b_hh_{l}"]
        h = jnp.zeros((B, H), jnp.float32)
        c = jnp.zeros((B, H), jnp.float32)
        outs = []
        for t in range(T):
            gates = seq[:, t, :] @ w_ih.T + h @ w_hh.T + bias
            i_g = jax.nn.sigmoid(gates[:, 0 * H:1 * H])
            f_g = jax.nn.sigmoid(gates[:, 1 * H:2 * H])
            g_g = jnp.tanh(gates[:, 2 * H:3 * H])
            o_g = jax.nn.sigmoid(gates[:, 3 * H:4 * H])
            c = f_g * c + i_g * g_g
            h = o_g * jnp.tanh(c)
            outs.append(h)
        seq = jnp.stack(outs, axis=1)
    out = seq.reshape(B * T, H) @ params["w_fc"].T + params["b_fc"]
    return out


# ---------------------------- deterministic params -----------------------------
def init_params(key):
    H, E, V = HIDDEN_DIM, EMBED_DIM, VOCAB_DIM
    params = {}
    keys = jax.random.split(key, 3 + 4 * LAYER_DIM)
    k_iter = iter(keys)

    def nrm(shape, scale=0.1):
        return scale * jax.random.normal(next(k_iter), shape, dtype=jnp.float32)

    params["embedding"] = nrm((V, E), 1.0)
    for l in range(LAYER_DIM):
        in_features = E if l == 0 else H
        params[f"w_ih_{l}"] = nrm((4 * H, in_features))
        params[f"w_hh_{l}"] = nrm((4 * H, H))
        params[f"b_ih_{l}"] = nrm((1, 4 * H))
        params[f"b_hh_{l}"] = nrm((1, 4 * H))
    params["w_fc"] = nrm((V, H))
    params["b_fc"] = nrm((1, V))
    return params


# ------------------------------------ main -------------------------------------
if __name__ == "__main__":
    key = jax.random.PRNGKey(0)
    k_param, k_tok = jax.random.split(key)

    params = init_params(k_param)
    x_tokens = jax.random.randint(k_tok, (BATCH, SEQ), 0, VOCAB_DIM, dtype=jnp.int32)

    out = jax.block_until_ready(language_rnn_forward(x_tokens, params))
    ref = jax.block_until_ready(language_rnn_reference(x_tokens, params))

    assert out.shape == (BATCH * SEQ, VOCAB_DIM), out.shape
    assert jnp.allclose(out, ref, atol=1e-4, rtol=1e-4), float(
        jnp.max(jnp.abs(out - ref))
    )

    print("KERNEL_OK")
</pallas_src>

<mosaic_0001>
module attributes {stable_mosaic.version = 11 : i64} {
  func.func @_lstm_lm_kernel(%arg0: i32, %arg1: memref<16x1xi32, #tpu.memory_space<vmem>>, %arg2: memref<224x128xf32, #tpu.memory_space<vmem>>, %arg3: memref<2x1x128xf32, #tpu.memory_space<vmem>>, %arg4: memref<32x128xf32, #tpu.memory_space<vmem>>, %arg5: memref<1x128xf32, #tpu.memory_space<vmem>>, %arg6: memref<16x128xf32, #tpu.memory_space<vmem>>) attributes {dimension_semantics = [#tpu.dimension_semantics<arbitrary>], iteration_bounds = array<i64: 1>, scalar_prefetch = 0 : i64, scratch_operands = 0 : i64, tpu.core_type = #tpu.core_type<tc>, window_params = [{pipeline_mode = #tpu.pipeline_mode<synchronous>, transform_indices = @transform_0, window_bounds = array<i64: 16, 1>}, {pipeline_mode = #tpu.pipeline_mode<synchronous>, transform_indices = @transform_1, window_bounds = array<i64: 224, 128>}, {pipeline_mode = #tpu.pipeline_mode<synchronous>, transform_indices = @transform_2, window_bounds = array<i64: 2, 1, 128>}, {pipeline_mode = #tpu.pipeline_mode<synchronous>, transform_indices = @transform_3, window_bounds = array<i64: 32, 128>}, {pipeline_mode = #tpu.pipeline_mode<synchronous>, transform_indices = @transform_4, window_bounds = array<i64: 1, 128>}, {pipeline_mode = #tpu.pipeline_mode<synchronous>, transform_indices = @transform_5, window_bounds = array<i64: 16, 128>}]} {
    %c0 = arith.constant 0 : index
    %c0_0 = arith.constant 0 : index
    %0 = vector.load %arg1[%c0, %c0_0] : memref<16x1xi32, #tpu.memory_space<vmem>>, vector<16x1xi32>
    %1 = tpu.iota {dimensions = array<i32: 1>} : vector<16x128xi32>
    %2 = vector.broadcast %0 : vector<16x1xi32> to vector<16x128xi32>
    %3 = arith.cmpi eq, %2, %1 : vector<16x128xi32>
    %4 = arith.extui %3 : vector<16x128xi1> to vector<16x128xi32>
    %5 = arith.sitofp %4 : vector<16x128xi32> to vector<16x128xf32>
    %c0_1 = arith.constant 0 : index
    %c0_2 = arith.constant 0 : index
    %6 = vector.load %arg2[%c0_1, %c0_2] : memref<224x128xf32, #tpu.memory_space<vmem>>, vector<128x128xf32>
    %c160 = arith.constant 160 : index
    %c0_3 = arith.constant 0 : index
    %7 = vector.load %arg2[%c160, %c0_3] : memref<224x128xf32, #tpu.memory_space<vmem>>, vector<32x128xf32>
    %c0_4 = arith.constant 0 : index
    %c0_5 = arith.constant 0 : index
    %c0_6 = arith.constant 0 : index
    %8 = vector.load %arg3[%c0_4, %c0_5, %c0_6] : memref<2x1x128xf32, #tpu.memory_space<vmem>>, vector<1x1x128xf32>
    %9 = vector.shape_cast %8 : vector<1x1x128xf32> to vector<1x128xf32>
    %cst = arith.constant dense<0.000000e+00> : vector<16x128xf32>
    %10 = tpu.matmul %5, %6, %cst {dimension_numbers = #tpu.dot_dimension_numbers<[1], [0], [0], [1], [0, 0, 1, 1], [], []>} : vector<16x128xf32>, vector<128x128xf32>, vector<16x128xf32> -> vector<16x128xf32>
    %11 = vector.broadcast %9 : vector<1x128xf32> to vector<16x128xf32>
    %12 = arith.addf %10, %11 : vector<16x128xf32>
    %cst_7 = arith.constant 0.000000e+00 : f32
    %13 = vector.broadcast %cst_7 : f32 to vector<2x32xf32>
    %cst_8 = arith.constant 0.000000e+00 : f32
    %14 = vector.broadcast %cst_8 : f32 to vector<2x32xf32>
    %15 = vector.extract_strided_slice %12 {offsets = [0, 0], sizes = [2, 128], strides = [1, 1]} : vector<16x128xf32> to vector<2x128xf32>
    %cst_9 = arith.constant dense<0.000000e+00> : vector<2x128xf32>
    %16 = tpu.matmul %13, %7, %cst_9 {dimension_numbers = #tpu.dot_dimension_numbers<[1], [0], [0], [1], [0, 0, 1, 1], [], []>} : vector<2x32xf32>, vector<32x128xf32>, vector<2x128xf32> -> vector<2x128xf32>
    %17 = arith.addf %15, %16 : vector<2x128xf32>
    %18 = vector.extract_strided_slice %17 {offsets = [0, 0], sizes = [2, 96], strides = [1, 1]} : vector<2x128xf32> to vector<2x96xf32>
    %19 = arith.negf %18 : vector<2x96xf32>
    %20 = math.exp %19 : vector<2x96xf32>
    %cst_10 = arith.constant 1.000000e+00 : f32
    %21 = vector.broadcast %cst_10 : f32 to vector<2x96xf32>
    %22 = arith.addf %21, %20 : vector<2x96xf32>
    %23 = arith.divf %21, %22 : vector<2x96xf32>
    %24 = vector.extract_strided_slice %17 {offsets = [0, 96], sizes = [2, 32], strides = [1, 1]} : vector<2x128xf32> to vector<2x32xf32>
    %25 = math.tanh %24 : vector<2x32xf32>
    %26 = vector.extract_strided_slice %23 {offsets = [0, 0], sizes = [2, 32], strides = [1, 1]} : vector<2x96xf32> to vector<2x32xf32>
    %27 = vector.extract_strided_slice %23 {offsets = [0, 32], sizes = [2, 32], strides = [1, 1]} : vector<2x96xf32> to vector<2x32xf32>
    %28 = vector.extract_strided_slice %23 {offsets = [0, 64], sizes = [2, 32], strides = [1, 1]} : vector<2x96xf32> to vector<2x32xf32>
    %29 = arith.mulf %27, %14 : vector<2x32xf32>
    %30 = arith.mulf %26, %25 : vector<2x32xf32>
    %31 = arith.addf %29, %30 : vector<2x32xf32>
    %32 = math.tanh %31 : vector<2x32xf32>
    %33 = arith.mulf %28, %32 : vector<2x32xf32>
    %34 = vector.extract_strided_slice %12 {offsets = [2, 0], sizes = [2, 128], strides = [1, 1]} : vector<16x128xf32> to vector<2x128xf32>
    %cst_11 = arith.constant dense<0.000000e+00> : vector<2x128xf32>
    %35 = tpu.matmul %33, %7, %cst_11 {dimension_numbers = #tpu.dot_dimension_numbers<[1], [0], [0], [1], [0, 0, 1, 1], [], []>} : vector<2x32xf32>, vector<32x128xf32>, vector<2x128xf32> -> vector<2x128xf32>
    %36 = arith.addf %34, %35 : vector<2x128xf32>
    %37 = vector.extract_strided_slice %36 {offsets = [0, 0], sizes = [2, 96], strides = [1, 1]} : vector<2x128xf32> to vector<2x96xf32>
    %38 = arith.negf %37 : vector<2x96xf32>
    %39 = math.exp %38 : vector<2x96xf32>
    %cst_12 = arith.constant 1.000000e+00 : f32
    %40 = vector.broadcast %cst_12 : f32 to vector<2x96xf32>
    %41 = arith.addf %40, %39 : vector<2x96xf32>
    %42 = arith.divf %40, %41 : vector<2x96xf32>
    %43 = vector.extract_strided_slice %36 {offsets = [0, 96], sizes = [2, 32], strides = [1, 1]} : vector<2x128xf32> to vector<2x32xf32>
    %44 = math.tanh %43 : vector<2x32xf32>
    %45 = vector.extract_strided_slice %42 {offsets = [0, 0], sizes = [2, 32], strides = [1, 1]} : vector<2x96xf32> to vector<2x32xf32>
    %46 = vector.extract_strided_slice %42 {offsets = [0, 32], sizes = [2, 32], strides = [1, 1]} : vector<2x96xf32> to vector<2x32xf32>
    %47 = vector.extract_strided_slice %42 {offsets = [0, 64], sizes = [2, 32], strides = [1, 1]} : vector<2x96xf32> to vector<2x32xf32>
    %48 = arith.mulf %46, %31 : vector<2x32xf32>
    %49 = arith.mulf %45, %44 : vector<2x32xf32>
    %50 = arith.addf %48, %49 : vector<2x32xf32>
    %51 = math.tanh %50 : vector<2x32xf32>
    %52 = arith.mulf %47, %51 : vector<2x32xf32>
    %53 = vector.extract_strided_slice %12 {offsets = [4, 0], sizes = [2, 128], strides = [1, 1]} : vector<16x128xf32> to vector<2x128xf32>
    %cst_13 = arith.constant dense<0.000000e+00> : vector<2x128xf32>
    %54 = tpu.matmul %52, %7, %cst_13 {dimension_numbers = #tpu.dot_dimension_numbers<[1], [0], [0], [1], [0, 0, 1, 1], [], []>} : vector<2x32xf32>, vector<32x128xf32>, vector<2x128xf32> -> vector<2x128xf32>
    %55 = arith.addf %53, %54 : vector<2x128xf32>
    %56 = vector.extract_strided_slice %55 {offsets = [0, 0], sizes = [2, 96], strides = [1, 1]} : vector<2x128xf32> to vector<2x96xf32>
    %57 = arith.negf %56 : vector<2x96xf32>
    %58 = math.exp %57 : vector<2x96xf32>
    %cst_14 = arith.constant 1.000000e+00 : f32
    %59 = vector.broadcast %cst_14 : f32 to vector<2x96xf32>
    %60 = arith.addf %59, %58 : vector<2x96xf32>
    %61 = arith.divf %59, %60 : vector<2x96xf32>
    %62 = vector.extract_strided_slice %55 {offsets = [0, 96], sizes = [2, 32], strides = [1, 1]} : vector<2x128xf32> to vector<2x32xf32>
    %63 = math.tanh %62 : vector<2x32xf32>
    %64 = vector.extract_strided_slice %61 {offsets = [0, 0], sizes = [2, 32], strides = [1, 1]} : vector<2x96xf32> to vector<2x32xf32>
    %65 = vector.extract_strided_slice %61 {offsets = [0, 32], sizes = [2, 32], strides = [1, 1]} : vector<2x96xf32> to vector<2x32xf32>
    %66 = vector.extract_strided_slice %61 {offsets = [0, 64], sizes = [2, 32], strides = [1, 1]} : vector<2x96xf32> to vector<2x32xf32>
    %67 = arith.mulf %65, %50 : vector<2x32xf32>
    %68 = arith.mulf %64, %63 : vector<2x32xf32>
    %69 = arith.addf %67, %68 : vector<2x32xf32>
    %70 = math.tanh %69 : vector<2x32xf32>
    %71 = arith.mulf %66, %70 : vector<2x32xf32>
    %72 = vector.extract_strided_slice %12 {offsets = [6, 0], sizes = [2, 128], strides = [1, 1]} : vector<16x128xf32> to vector<2x128xf32>
    %cst_15 = arith.constant dense<0.000000e+00> : vector<2x128xf32>
    %73 = tpu.matmul %71, %7, %cst_15 {dimension_numbers = #tpu.dot_dimension_numbers<[1], [0], [0], [1], [0, 0, 1, 1], [], []>} : vector<2x32xf32>, vector<32x128xf32>, vector<2x128xf32> -> vector<2x128xf32>
    %74 = arith.addf %72, %73 : vector<2x128xf32>
    %75 = vector.extract_strided_slice %74 {offsets = [0, 0], sizes = [2, 96], strides = [1, 1]} : vector<2x128xf32> to vector<2x96xf32>
    %76 = arith.negf %75 : vector<2x96xf32>
    %77 = math.exp %76 : vector<2x96xf32>
    %cst_16 = arith.constant 1.000000e+00 : f32
    %78 = vector.broadcast %cst_16 : f32 to vector<2x96xf32>
    %79 = arith.addf %78, %77 : vector<2x96xf32>
    %80 = arith.divf %78, %79 : vector<2x96xf32>
    %81 = vector.extract_strided_slice %74 {offsets = [0, 96], sizes = [2, 32], strides = [1, 1]} : vector<2x128xf32> to vector<2x32xf32>
    %82 = math.tanh %81 : vector<2x32xf32>
    %83 = vector.extract_strided_slice %80 {offsets = [0, 0], sizes = [2, 32], strides = [1, 1]} : vector<2x96xf32> to vector<2x32xf32>
    %84 = vector.extract_strided_slice %80 {offsets = [0, 32], sizes = [2, 32], strides = [1, 1]} : vector<2x96xf32> to vector<2x32xf32>
    %85 = vector.extract_strided_slice %80 {offsets = [0, 64], sizes = [2, 32], strides = [1, 1]} : vector<2x96xf32> to vector<2x32xf32>
    %86 = arith.mulf %84, %69 : vector<2x32xf32>
    %87 = arith.mulf %83, %82 : vector<2x32xf32>
    %88 = arith.addf %86, %87 : vector<2x32xf32>
    %89 = math.tanh %88 : vector<2x32xf32>
    %90 = arith.mulf %85, %89 : vector<2x32xf32>
    %91 = vector.extract_strided_slice %12 {offsets = [8, 0], sizes = [2, 128], strides = [1, 1]} : vector<16x128xf32> to vector<2x128xf32>
    %cst_17 = arith.constant dense<0.000000e+00> : vector<2x128xf32>
    %92 = tpu.matmul %90, %7, %cst_17 {dimension_numbers = #tpu.dot_dimension_numbers<[1], [0], [0], [1], [0, 0, 1, 1], [], []>} : vector<2x32xf32>, vector<32x128xf32>, vector<2x128xf32> -> vector<2x128xf32>
    %93 = arith.addf %91, %92 : vector<2x128xf32>
    %94 = vector.extract_strided_slice %93 {offsets = [0, 0], sizes = [2, 96], strides = [1, 1]} : vector<2x128xf32> to vector<2x96xf32>
    %95 = arith.negf %94 : vector<2x96xf32>
    %96 = math.exp %95 : vector<2x96xf32>
    %cst_18 = arith.constant 1.000000e+00 : f32
    %97 = vector.broadcast %cst_18 : f32 to vector<2x96xf32>
    %98 = arith.addf %97, %96 : vector<2x96xf32>
    %99 = arith.divf %97, %98 : vector<2x96xf32>
    %100 = vector.extract_strided_slice %93 {offsets = [0, 96], sizes = [2, 32], strides = [1, 1]} : vector<2x128xf32> to vector<2x32xf32>
    %101 = math.tanh %100 : vector<2x32xf32>
    %102 = vector.extract_strided_slice %99 {offsets = [0, 0], sizes = [2, 32], strides = [1, 1]} : vector<2x96xf32> to vector<2x32xf32>
    %103 = vector.extract_strided_slice %99 {offsets = [0, 32], sizes = [2, 32], strides = [1, 1]} : vector<2x96xf32> to vector<2x32xf32>
    %104 = vector.extract_strided_slice %99 {offsets = [0, 64], sizes = [2, 32], strides = [1, 1]} : vector<2x96xf32> to vector<2x32xf32>
    %105 = arith.mulf %103, %88 : vector<2x32xf32>
    %106 = arith.mulf %102, %101 : vector<2x32xf32>
    %107 = arith.addf %105, %106 : vector<2x32xf32>
    %108 = math.tanh %107 : vector<2x32xf32>
    %109 = arith.mulf %104, %108 : vector<2x32xf32>
    %110 = vector.extract_strided_slice %12 {offsets = [10, 0], sizes = [2, 128], strides = [1, 1]} : vector<16x128xf32> to vector<2x128xf32>
    %cst_19 = arith.constant dense<0.000000e+00> : vector<2x128xf32>
    %111 = tpu.matmul %109, %7, %cst_19 {dimension_numbers = #tpu.dot_dimension_numbers<[1], [0], [0], [1], [0, 0, 1, 1], [], []>} : vector<2x32xf32>, vector<32x128xf32>, vector<2x128xf32> -> vector<2x128xf32>
    %112 = arith.addf %110, %111 : vector<2x128xf32>
    %113 = vector.extract_strided_slice %112 {offsets = [0, 0], sizes = [2, 96], strides = [1, 1]} : vector<2x128xf32> to vector<2x96xf32>
    %114 = arith.negf %113 : vector<2x96xf32>
    %115 = math.exp %114 : vector<2x96xf32>
    %cst_20 = arith.constant 1.000000e+00 : f32
    %116 = vector.broadcast %cst_20 : f32 to vector<2x96xf32>
    %117 = arith.addf %116, %115 : vector<2x96xf32>
    %118 = arith.divf %116, %117 : vector<2x96xf32>
    %119 = vector.extract_strided_slice %112 {offsets = [0, 96], sizes = [2, 32], strides = [1, 1]} : vector<2x128xf32> to vector<2x32xf32>
    %120 = math.tanh %119 : vector<2x32xf32>
    %121 = vector.extract_strided_slice %118 {offsets = [0, 0], sizes = [2, 32], strides = [1, 1]} : vector<2x96xf32> to vector<2x32xf32>
    %122 = vector.extract_strided_slice %118 {offsets = [0, 32], sizes = [2, 32], strides = [1, 1]} : vector<2x96xf32> to vector<2x32xf32>
    %123 = vector.extract_strided_slice %118 {offsets = [0, 64], sizes = [2, 32], strides = [1, 1]} : vector<2x96xf32> to vector<2x32xf32>
    %124 = arith.mulf %122, %107 : vector<2x32xf32>
    %125 = arith.mulf %121, %120 : vector<2x32xf32>
    %126 = arith.addf %124, %125 : vector<2x32xf32>
    %127 = math.tanh %126 : vector<2x32xf32>
    %128 = arith.mulf %123, %127 : vector<2x32xf32>
    %129 = vector.extract_strided_slice %12 {offsets = [12, 0], sizes = [2, 128], strides = [1, 1]} : vector<16x128xf32> to vector<2x128xf32>
    %cst_21 = arith.constant dense<0.000000e+00> : vector<2x128xf32>
    %130 = tpu.matmul %128, %7, %cst_21 {dimension_numbers = #tpu.dot_dimension_numbers<[1], [0], [0], [1], [0, 0, 1, 1], [], []>} : vector<2x32xf32>, vector<32x128xf32>, vector<2x128xf32> -> vector<2x128xf32>
    %131 = arith.addf %129, %130 : vector<2x128xf32>
    %132 = vector.extract_strided_slice %131 {offsets = [0, 0], sizes = [2, 96], strides = [1, 1]} : vector<2x128xf32> to vector<2x96xf32>
    %133 = arith.negf %132 : vector<2x96xf32>
    %134 = math.exp %133 : vector<2x96xf32>
    %cst_22 = arith.constant 1.000000e+00 : f32
    %135 = vector.broadcast %cst_22 : f32 to vector<2x96xf32>
    %136 = arith.addf %135, %134 : vector<2x96xf32>
    %137 = arith.divf %135, %136 : vector<2x96xf32>
    %138 = vector.extract_strided_slice %131 {offsets = [0, 96], sizes = [2, 32], strides = [1, 1]} : vector<2x128xf32> to vector<2x32xf32>
    %139 = math.tanh %138 : vector<2x32xf32>
    %140 = vector.extract_strided_slice %137 {offsets = [0, 0], sizes = [2, 32], strides = [1, 1]} : vector<2x96xf32> to vector<2x32xf32>
    %141 = vector.extract_strided_slice %137 {offsets = [0, 32], sizes = [2, 32], strides = [1, 1]} : vector<2x96xf32> to vector<2x32xf32>
    %142 = vector.extract_strided_slice %137 {offsets = [0, 64], sizes = [2, 32], strides = [1, 1]} : vector<2x96xf32> to vector<2x32xf32>
    %143 = arith.mulf %141, %126 : vector<2x32xf32>
    %144 = arith.mulf %140, %139 : vector<2x32xf32>
    %145 = arith.addf %143, %144 : vector<2x32xf32>
    %146 = math.tanh %145 : vector<2x32xf32>
    %147 = arith.mulf %142, %146 : vector<2x32xf32>
    %148 = vector.extract_strided_slice %12 {offsets = [14, 0], sizes = [2, 128], strides = [1, 1]} : vector<16x128xf32> to vector<2x128xf32>
    %cst_23 = arith.constant dense<0.000000e+00> : vector<2x128xf32>
    %149 = tpu.matmul %147, %7, %cst_23 {dimension_numbers = #tpu.dot_dimension_numbers<[1], [0], [0], [1], [0, 0, 1, 1], [], []>} : vector<2x32xf32>, vector<32x128xf32>, vector<2x128xf32> -> vector<2x128xf32>
    %150 = arith.addf %148, %149 : vector<2x128xf32>
    %151 = vector.extract_strided_slice %150 {offsets = [0, 0], sizes = [2, 96], strides = [1, 1]} : vector<2x128xf32> to vector<2x96xf32>
    %152 = arith.negf %151 : vector<2x96xf32>
    %153 = math.exp %152 : vector<2x96xf32>
    %cst_24 = arith.constant 1.000000e+00 : f32
    %154 = vector.broadcast %cst_24 : f32 to vector<2x96xf32>
    %155 = arith.addf %154, %153 : vector<2x96xf32>
    %156 = arith.divf %154, %155 : vector<2x96xf32>
    %157 = vector.extract_strided_slice %150 {offsets = [0, 96], sizes = [2, 32], strides = [1, 1]} : vector<2x128xf32> to vector<2x32xf32>
    %158 = math.tanh %157 : vector<2x32xf32>
    %159 = vector.extract_strided_slice %156 {offsets = [0, 0], sizes = [2, 32], strides = [1, 1]} : vector<2x96xf32> to vector<2x32xf32>
    %160 = vector.extract_strided_slice %156 {offsets = [0, 32], sizes = [2, 32], strides = [1, 1]} : vector<2x96xf32> to vector<2x32xf32>
    %161 = vector.extract_strided_slice %156 {offsets = [0, 64], sizes = [2, 32], strides = [1, 1]} : vector<2x96xf32> to vector<2x32xf32>
    %162 = arith.mulf %160, %145 : vector<2x32xf32>
    %163 = arith.mulf %159, %158 : vector<2x32xf32>
    %164 = arith.addf %162, %163 : vector<2x32xf32>
    %165 = math.tanh %164 : vector<2x32xf32>
    %166 = arith.mulf %161, %165 : vector<2x32xf32>
    %167 = tpu.concatenate %33, %52, %71, %90, %109, %128, %147, %166 in 0 : vector<2x32xf32>, vector<2x32xf32>, vector<2x32xf32>, vector<2x32xf32>, vector<2x32xf32>, vector<2x32xf32>, vector<2x32xf32>, vector<2x32xf32> -> vector<16x32xf32>
    %c128 = arith.constant 128 : index
    %c0_25 = arith.constant 0 : index
    %168 = vector.load %arg2[%c128, %c0_25] : memref<224x128xf32, #tpu.memory_space<vmem>>, vector<32x128xf32>
    %c192 = arith.constant 192 : index
    %c0_26 = arith.constant 0 : index
    %169 = vector.load %arg2[%c192, %c0_26] : memref<224x128xf32, #tpu.memory_space<vmem>>, vector<32x128xf32>
    %c1 = arith.constant 1 : index
    %c0_27 = arith.constant 0 : index
    %c0_28 = arith.constant 0 : index
    %170 = vector.load %arg3[%c1, %c0_27, %c0_28] : memref<2x1x128xf32, #tpu.memory_space<vmem>>, vector<1x1x128xf32>
    %171 = vector.shape_cast %170 : vector<1x1x128xf32> to vector<1x128xf32>
    %cst_29 = arith.constant dense<0.000000e+00> : vector<16x128xf32>
    %172 = tpu.matmul %167, %168, %cst_29 {dimension_numbers = #tpu.dot_dimension_numbers<[1], [0], [0], [1], [0, 0, 1, 1], [], []>} : vector<16x32xf32>, vector<32x128xf32>, vector<16x128xf32> -> vector<16x128xf32>
    %173 = vector.broadcast %171 : vector<1x128xf32> to vector<16x128xf32>
    %174 = arith.addf %172, %173 : vector<16x128xf32>
    %cst_30 = arith.constant 0.000000e+00 : f32
    %175 = vector.broadcast %cst_30 : f32 to vector<2x32xf32>
    %cst_31 = arith.constant 0.000000e+00 : f32
    %176 = vector.broadcast %cst_31 : f32 to vector<2x32xf32>
    %177 = vector.extract_strided_slice %174 {offsets = [0, 0], sizes = [2, 128], strides = [1, 1]} : vector<16x128xf32> to vector<2x128xf32>
    %cst_32 = arith.constant dense<0.000000e+00> : vector<2x128xf32>
    %178 = tpu.matmul %175, %169, %cst_32 {dimension_numbers = #tpu.dot_dimension_numbers<[1], [0], [0], [1], [0, 0, 1, 1], [], []>} : vector<2x32xf32>, vector<32x128xf32>, vector<2x128xf32> -> vector<2x128xf32>
    %179 = arith.addf %177, %178 : vector<2x128xf32>
    %180 = vector.extract_strided_slice %179 {offsets = [0, 0], sizes = [2, 96], strides = [1, 1]} : vector<2x128xf32> to vector<2x96xf32>
    %181 = arith.negf %180 : vector<2x96xf32>
    %182 = math.exp %181 : vector<2x96xf32>
    %cst_33 = arith.constant 1.000000e+00 : f32
    %183 = vector.broadcast %cst_33 : f32 to vector<2x96xf32>
    %184 = arith.addf %183, %182 : vector<2x96xf32>
    %185 = arith.divf %183, %184 : vector<2x96xf32>
    %186 = vector.extract_strided_slice %179 {offsets = [0, 96], sizes = [2, 32], strides = [1, 1]} : vector<2x128xf32> to vector<2x32xf32>
    %187 = math.tanh %186 : vector<2x32xf32>
    %188 = vector.extract_strided_slice %185 {offsets = [0, 0], sizes = [2, 32], strides = [1, 1]} : vector<2x96xf32> to vector<2x32xf32>
    %189 = vector.extract_strided_slice %185 {offsets = [0, 32], sizes = [2, 32], strides = [1, 1]} : vector<2x96xf32> to vector<2x32xf32>
    %190 = vector.extract_strided_slice %185 {offsets = [0, 64], sizes = [2, 32], strides = [1, 1]} : vector<2x96xf32> to vector<2x32xf32>
    %191 = arith.mulf %189, %176 : vector<2x32xf32>
    %192 = arith.mulf %188, %187 : vector<2x32xf32>
    %193 = arith.addf %191, %192 : vector<2x32xf32>
    %194 = math.tanh %193 : vector<2x32xf32>
    %195 = arith.mulf %190, %194 : vector<2x32xf32>
    %196 = vector.extract_strided_slice %174 {offsets = [2, 0], sizes = [2, 128], strides = [1, 1]} : vector<16x128xf32> to vector<2x128xf32>
    %cst_34 = arith.constant dense<0.000000e+00> : vector<2x128xf32>
    %197 = tpu.matmul %195, %169, %cst_34 {dimension_numbers = #tpu.dot_dimension_numbers<[1], [0], [0], [1], [0, 0, 1, 1], [], []>} : vector<2x32xf32>, vector<32x128xf32>, vector<2x128xf32> -> vector<2x128xf32>
    %198 = arith.addf %196, %197 : vector<2x128xf32>
    %199 = vector.extract_strided_slice %198 {offsets = [0, 0], sizes = [2, 96], strides = [1, 1]} : vector<2x128xf32> to vector<2x96xf32>
    %200 = arith.negf %199 : vector<2x96xf32>
    %201 = math.exp %200 : vector<2x96xf32>
    %cst_35 = arith.constant 1.000000e+00 : f32
    %202 = vector.broadcast %cst_35 : f32 to vector<2x96xf32>
    %203 = arith.addf %202, %201 : vector<2x96xf32>
    %204 = arith.divf %202, %203 : vector<2x96xf32>
    %205 = vector.extract_strided_slice %198 {offsets = [0, 96], sizes = [2, 32], strides = [1, 1]} : vector<2x128xf32> to vector<2x32xf32>
    %206 = math.tanh %205 : vector<2x32xf32>
    %207 = vector.extract_strided_slice %204 {offsets = [0, 0], sizes = [2, 32], strides = [1, 1]} : vector<2x96xf32> to vector<2x32xf32>
    %208 = vector.extract_strided_slice %204 {offsets = [0, 32], sizes = [2, 32], strides = [1, 1]} : vector<2x96xf32> to vector<2x32xf32>
    %209 = vector.extract_strided_slice %204 {offsets = [0, 64], sizes = [2, 32], strides = [1, 1]} : vector<2x96xf32> to vector<2x32xf32>
    %210 = arith.mulf %208, %193 : vector<2x32xf32>
    %211 = arith.mulf %207, %206 : vector<2x32xf32>
    %212 = arith.addf %210, %211 : vector<2x32xf32>
    %213 = math.tanh %212 : vector<2x32xf32>
    %214 = arith.mulf %209, %213 : vector<2x32xf32>
    %215 = vector.extract_strided_slice %174 {offsets = [4, 0], sizes = [2, 128], strides = [1, 1]} : vector<16x128xf32> to vector<2x128xf32>
    %cst_36 = arith.constant dense<0.000000e+00> : vector<2x128xf32>
    %216 = tpu.matmul %214, %169, %cst_36 {dimension_numbers = #tpu.dot_dimension_numbers<[1], [0], [0], [1], [0, 0, 1, 1], [], []>} : vector<2x32xf32>, vector<32x128xf32>, vector<2x128xf32> -> vector<2x128xf32>
    %217 = arith.addf %215, %216 : vector<2x128xf32>
    %218 = vector.extract_strided_slice %217 {offsets = [0, 0], sizes = [2, 96], strides = [1, 1]} : vector<2x128xf32> to vector<2x96xf32>
    %219 = arith.negf %218 : vector<2x96xf32>
    %220 = math.exp %219 : vector<2x96xf32>
    %cst_37 = arith.constant 1.000000e+00 : f32
    %221 = vector.broadcast %cst_37 : f32 to vector<2x96xf32>
    %222 = arith.addf %221, %220 : vector<2x96xf32>
    %223 = arith.divf %221, %222 : vector<2x96xf32>
    %224 = vector.extract_strided_slice %217 {offsets = [0, 96], sizes = [2, 32], strides = [1, 1]} : vector<2x128xf32> to vector<2x32xf32>
    %225 = math.tanh %224 : vector<2x32xf32>
    %226 = vector.extract_strided_slice %223 {offsets = [0, 0], sizes = [2, 32], strides = [1, 1]} : vector<2x96xf32> to vector<2x32xf32>
    %227 = vector.extract_strided_slice %223 {offsets = [0, 32], sizes = [2, 32], strides = [1, 1]} : vector<2x96xf32> to vector<2x32xf32>
    %228 = vector.extract_strided_slice %223 {offsets = [0, 64], sizes = [2, 32], strides = [1, 1]} : vector<2x96xf32> to vector<2x32xf32>
    %229 = arith.mulf %227, %212 : vector<2x32xf32>
    %230 = arith.mulf %226, %225 : vector<2x32xf32>
    %231 = arith.addf %229, %230 : vector<2x32xf32>
    %232 = math.tanh %231 : vector<2x32xf32>
    %233 = arith.mulf %228, %232 : vector<2x32xf32>
    %234 = vector.extract_strided_slice %174 {offsets = [6, 0], sizes = [2, 128], strides = [1, 1]} : vector<16x128xf32> to vector<2x128xf32>
    %cst_38 = arith.constant dense<0.000000e+00> : vector<2x128xf32>
    %235 = tpu.matmul %233, %169, %cst_38 {dimension_numbers = #tpu.dot_dimension_numbers<[1], [0], [0], [1], [0, 0, 1, 1], [], []>} : vector<2x32xf32>, vector<32x128xf32>, vector<2x128xf32> -> vector<2x128xf32>
    %236 = arith.addf %234, %235 : vector<2x128xf32>
    %237 = vector.extract_strided_slice %236 {offsets = [0, 0], sizes = [2, 96], strides = [1, 1]} : vector<2x128xf32> to vector<2x96xf32>
    %238 = arith.negf %237 : vector<2x96xf32>
    %239 = math.exp %238 : vector<2x96xf32>
    %cst_39 = arith.constant 1.000000e+00 : f32
    %240 = vector.broadcast %cst_39 : f32 to vector<2x96xf32>
    %241 = arith.addf %240, %239 : vector<2x96xf32>
    %242 = arith.divf %240, %241 : vector<2x96xf32>
    %243 = vector.extract_strided_slice %236 {offsets = [0, 96], sizes = [2, 32], strides = [1, 1]} : vector<2x128xf32> to vector<2x32xf32>
    %244 = math.tanh %243 : vector<2x32xf32>
    %245 = vector.extract_strided_slice %242 {offsets = [0, 0], sizes = [2, 32], strides = [1, 1]} : vector<2x96xf32> to vector<2x32xf32>
    %246 = vector.extract_strided_slice %242 {offsets = [0, 32], sizes = [2, 32], strides = [1, 1]} : vector<2x96xf32> to vector<2x32xf32>
    %247 = vector.extract_strided_slice %242 {offsets = [0, 64], sizes = [2, 32], strides = [1, 1]} : vector<2x96xf32> to vector<2x32xf32>
    %248 = arith.mulf %246, %231 : vector<2x32xf32>
    %249 = arith.mulf %245, %244 : vector<2x32xf32>
    %250 = arith.addf %248, %249 : vector<2x32xf32>
    %251 = math.tanh %250 : vector<2x32xf32>
    %252 = arith.mulf %247, %251 : vector<2x32xf32>
    %253 = vector.extract_strided_slice %174 {offsets = [8, 0], sizes = [2, 128], strides = [1, 1]} : vector<16x128xf32> to vector<2x128xf32>
    %cst_40 = arith.constant dense<0.000000e+00> : vector<2x128xf32>
    %254 = tpu.matmul %252, %169, %cst_40 {dimension_numbers = #tpu.dot_dimension_numbers<[1], [0], [0], [1], [0, 0, 1, 1], [], []>} : vector<2x32xf32>, vector<32x128xf32>, vector<2x128xf32> -> vector<2x128xf32>
    %255 = arith.addf %253, %254 : vector<2x128xf32>
    %256 = vector.extract_strided_slice %255 {offsets = [0, 0], sizes = [2, 96], strides = [1, 1]} : vector<2x128xf32> to vector<2x96xf32>
    %257 = arith.negf %256 : vector<2x96xf32>
    %258 = math.exp %257 : vector<2x96xf32>
    %cst_41 = arith.constant 1.000000e+00 : f32
    %259 = vector.broadcast %cst_41 : f32 to vector<2x96xf32>
    %260 = arith.addf %259, %258 : vector<2x96xf32>
    %261 = arith.divf %259, %260 : vector<2x96xf32>
    %262 = vector.extract_strided_slice %255 {offsets = [0, 96], sizes = [2, 32], strides = [1, 1]} : vector<2x128xf32> to vector<2x32xf32>
    %263 = math.tanh %262 : vector<2x32xf32>
    %264 = vector.extract_strided_slice %261 {offsets = [0, 0], sizes = [2, 32], strides = [1, 1]} : vector<2x96xf32> to vector<2x32xf32>
    %265 = vector.extract_strided_slice %261 {offsets = [0, 32], sizes = [2, 32], strides = [1, 1]} : vector<2x96xf32> to vector<2x32xf32>
    %266 = vector.extract_strided_slice %261 {offsets = [0, 64], sizes = [2, 32], strides = [1, 1]} : vector<2x96xf32> to vector<2x32xf32>
    %267 = arith.mulf %265, %250 : vector<2x32xf32>
    %268 = arith.mulf %264, %263 : vector<2x32xf32>
    %269 = arith.addf %267, %268 : vector<2x32xf32>
    %270 = math.tanh %269 : vector<2x32xf32>
    %271 = arith.mulf %266, %270 : vector<2x32xf32>
    %272 = vector.extract_strided_slice %174 {offsets = [10, 0], sizes = [2, 128], strides = [1, 1]} : vector<16x128xf32> to vector<2x128xf32>
    %cst_42 = arith.constant dense<0.000000e+00> : vector<2x128xf32>
    %273 = tpu.matmul %271, %169, %cst_42 {dimension_numbers = #tpu.dot_dimension_numbers<[1], [0], [0], [1], [0, 0, 1, 1], [], []>} : vector<2x32xf32>, vector<32x128xf32>, vector<2x128xf32> -> vector<2x128xf32>
    %274 = arith.addf %272, %273 : vector<2x128xf32>
    %275 = vector.extract_strided_slice %274 {offsets = [0, 0], sizes = [2, 96], strides = [1, 1]} : vector<2x128xf32> to vector<2x96xf32>
    %276 = arith.negf %275 : vector<2x96xf32>
    %277 = math.exp %276 : vector<2x96xf32>
    %cst_43 = arith.constant 1.000000e+00 : f32
    %278 = vector.broadcast %cst_43 : f32 to vector<2x96xf32>
    %279 = arith.addf %278, %277 : vector<2x96xf32>
    %280 = arith.divf %278, %279 : vector<2x96xf32>
    %281 = vector.extract_strided_slice %274 {offsets = [0, 96], sizes = [2, 32], strides = [1, 1]} : vector<2x128xf32> to vector<2x32xf32>
    %282 = math.tanh %281 : vector<2x32xf32>
    %283 = vector.extract_strided_slice %280 {offsets = [0, 0], sizes = [2, 32], strides = [1, 1]} : vector<2x96xf32> to vector<2x32xf32>
    %284 = vector.extract_strided_slice %280 {offsets = [0, 32], sizes = [2, 32], strides = [1, 1]} : vector<2x96xf32> to vector<2x32xf32>
    %285 = vector.extract_strided_slice %280 {offsets = [0, 64], sizes = [2, 32], strides = [1, 1]} : vector<2x96xf32> to vector<2x32xf32>
    %286 = arith.mulf %284, %269 : vector<2x32xf32>
    %287 = arith.mulf %283, %282 : vector<2x32xf32>
    %288 = arith.addf %286, %287 : vector<2x32xf32>
    %289 = math.tanh %288 : vector<2x32xf32>
    %290 = arith.mulf %285, %289 : vector<2x32xf32>
    %291 = vector.extract_strided_slice %174 {offsets = [12, 0], sizes = [2, 128], strides = [1, 1]} : vector<16x128xf32> to vector<2x128xf32>
    %cst_44 = arith.constant dense<0.000000e+00> : vector<2x128xf32>
    %292 = tpu.matmul %290, %169, %cst_44 {dimension_numbers = #tpu.dot_dimension_numbers<[1], [0], [0], [1], [0, 0, 1, 1], [], []>} : vector<2x32xf32>, vector<32x128xf32>, vector<2x128xf32> -> vector<2x128xf32>
    %293 = arith.addf %291, %292 : vector<2x128xf32>
    %294 = vector.extract_strided_slice %293 {offsets = [0, 0], sizes = [2, 96], strides = [1, 1]} : vector<2x128xf32> to vector<2x96xf32>
    %295 = arith.negf %294 : vector<2x96xf32>
    %296 = math.exp %295 : vector<2x96xf32>
    %cst_45 = arith.constant 1.000000e+00 : f32
    %297 = vector.broadcast %cst_45 : f32 to vector<2x96xf32>
    %298 = arith.addf %297, %296 : vector<2x96xf32>
    %299 = arith.divf %297, %298 : vector<2x96xf32>
    %300 = vector.extract_strided_slice %293 {offsets = [0, 96], sizes = [2, 32], strides = [1, 1]} : vector<2x128xf32> to vector<2x32xf32>
    %301 = math.tanh %300 : vector<2x32xf32>
    %302 = vector.extract_strided_slice %299 {offsets = [0, 0], sizes = [2, 32], strides = [1, 1]} : vector<2x96xf32> to vector<2x32xf32>
    %303 = vector.extract_strided_slice %299 {offsets = [0, 32], sizes = [2, 32], strides = [1, 1]} : vector<2x96xf32> to vector<2x32xf32>
    %304 = vector.extract_strided_slice %299 {offsets = [0, 64], sizes = [2, 32], strides = [1, 1]} : vector<2x96xf32> to vector<2x32xf32>
    %305 = arith.mulf %303, %288 : vector<2x32xf32>
    %306 = arith.mulf %302, %301 : vector<2x32xf32>
    %307 = arith.addf %305, %306 : vector<2x32xf32>
    %308 = math.tanh %307 : vector<2x32xf32>
    %309 = arith.mulf %304, %308 : vector<2x32xf32>
    %310 = vector.extract_strided_slice %174 {offsets = [14, 0], sizes = [2, 128], strides = [1, 1]} : vector<16x128xf32> to vector<2x128xf32>
    %cst_46 = arith.constant dense<0.000000e+00> : vector<2x128xf32>
    %311 = tpu.matmul %309, %169, %cst_46 {dimension_numbers = #tpu.dot_dimension_numbers<[1], [0], [0], [1], [0, 0, 1, 1], [], []>} : vector<2x32xf32>, vector<32x128xf32>, vector<2x128xf32> -> vector<2x128xf32>
    %312 = arith.addf %310, %311 : vector<2x128xf32>
    %313 = vector.extract_strided_slice %312 {offsets = [0, 0], sizes = [2, 96], strides = [1, 1]} : vector<2x128xf32> to vector<2x96xf32>
    %314 = arith.negf %313 : vector<2x96xf32>
    %315 = math.exp %314 : vector<2x96xf32>
    %cst_47 = arith.constant 1.000000e+00 : f32
    %316 = vector.broadcast %cst_47 : f32 to vector<2x96xf32>
    %317 = arith.addf %316, %315 : vector<2x96xf32>
    %318 = arith.divf %316, %317 : vector<2x96xf32>
    %319 = vector.extract_strided_slice %312 {offsets = [0, 96], sizes = [2, 32], strides = [1, 1]} : vector<2x128xf32> to vector<2x32xf32>
    %320 = math.tanh %319 : vector<2x32xf32>
    %321 = vector.extract_strided_slice %318 {offsets = [0, 0], sizes = [2, 32], strides = [1, 1]} : vector<2x96xf32> to vector<2x32xf32>
    %322 = vector.extract_strided_slice %318 {offsets = [0, 32], sizes = [2, 32], strides = [1, 1]} : vector<2x96xf32> to vector<2x32xf32>
    %323 = vector.extract_strided_slice %318 {offsets = [0, 64], sizes = [2, 32], strides = [1, 1]} : vector<2x96xf32> to vector<2x32xf32>
    %324 = arith.mulf %322, %307 : vector<2x32xf32>
    %325 = arith.mulf %321, %320 : vector<2x32xf32>
    %326 = arith.addf %324, %325 : vector<2x32xf32>
    %327 = math.tanh %326 : vector<2x32xf32>
    %328 = arith.mulf %323, %327 : vector<2x32xf32>
    %329 = tpu.concatenate %195, %214, %233, %252, %271, %290, %309, %328 in 0 : vector<2x32xf32>, vector<2x32xf32>, vector<2x32xf32>, vector<2x32xf32>, vector<2x32xf32>, vector<2x32xf32>, vector<2x32xf32>, vector<2x32xf32> -> vector<16x32xf32>
    %c0_48 = arith.constant 0 : index
    %c0_49 = arith.constant 0 : index
    %330 = vector.load %arg4[%c0_48, %c0_49] : memref<32x128xf32, #tpu.memory_space<vmem>>, vector<32x128xf32>
    %cst_50 = arith.constant dense<0.000000e+00> : vector<16x128xf32>
    %331 = tpu.matmul %329, %330, %cst_50 {dimension_numbers = #tpu.dot_dimension_numbers<[1], [0], [0], [1], [0, 0, 1, 1], [], []>} : vector<16x32xf32>, vector<32x128xf32>, vector<16x128xf32> -> vector<16x128xf32>
    %c0_51 = arith.constant 0 : index
    %c0_52 = arith.constant 0 : index
    %332 = vector.load %arg5[%c0_51, %c0_52] : memref<1x128xf32, #tpu.memory_space<vmem>>, vector<1x128xf32>
    %333 = vector.broadcast %332 : vector<1x128xf32> to vector<16x128xf32>
    %334 = arith.addf %331, %333 : vector<16x128xf32>
    %c0_53 = arith.constant 0 : index
    %c0_54 = arith.constant 0 : index
    %335 = vector.load %arg6[%c0_53, %c0_54] : memref<16x128xf32, #tpu.memory_space<vmem>>, vector<16x128xf32>
    tpu.vector_store %arg6[%c0_53, %c0_54], %334 {strides = array<i32>} : memref<16x128xf32, #tpu.memory_space<vmem>>, vector<16x128xf32>,
    return
  }
  func.func @transform_0(%arg0: i32) -> (i32, i32) {
    %c0_i32 = arith.constant 0 : i32
    %c0_i32_0 = arith.constant 0 : i32
    %c0_i32_1 = arith.constant 0 : i32
    return %c0_i32, %c0_i32_0 : i32, i32
  }
  func.func @transform_1(%arg0: i32) -> (i32, i32) {
    %c0_i32 = arith.constant 0 : i32
    %c0_i32_0 = arith.constant 0 : i32
    %c0_i32_1 = arith.constant 0 : i32
    return %c0_i32, %c0_i32_0 : i32, i32
  }
  func.func @transform_2(%arg0: i32) -> (i32, i32, i32) {
    %c0_i32 = arith.constant 0 : i32
    %c0_i32_0 = arith.constant 0 : i32
    %c0_i32_1 = arith.constant 0 : i32
    %c0_i32_2 = arith.constant 0 : i32
    return %c0_i32, %c0_i32_0, %c0_i32_1 : i32, i32, i32
  }
  func.func @transform_3(%arg0: i32) -> (i32, i32) {
    %c0_i32 = arith.constant 0 : i32
    %c0_i32_0 = arith.constant 0 : i32
    %c0_i32_1 = arith.constant 0 : i32
    return %c0_i32, %c0_i32_0 : i32, i32
  }
  func.func @transform_4(%arg0: i32) -> (i32, i32) {
    %c0_i32 = arith.constant 0 : i32
    %c0_i32_0 = arith.constant 0 : i32
    %c0_i32_1 = arith.constant 0 : i32
    return %c0_i32, %c0_i32_0 : i32, i32
  }
  func.func @transform_5(%arg0: i32) -> (i32, i32) {
    %c0_i32 = arith.constant 0 : i32
    %c0_i32_0 = arith.constant 0 : i32
    %c0_i32_1 = arith.constant 0 : i32
    return %c0_i32, %c0_i32_0 : i32, i32
  }
}

</mosaic_0001>

<bundles_post_ra>
// kernel: tpu_custom_call.1
= control target key start
LH: loop header
LB: loop body
LE: loop exit
PB: predicated region body
PF: predicated region fallthrough
CT: control target
= control target key end

     0   :  { %10 = vsyncpa [#allocation3], 0  ;;  %s3173_s0 = inlined_call_operand.vmem [shape: s32[16,1], index: 0, kind: input, shape index: {}]   ;;  %s3174_s1 = inlined_call_operand.hbm [shape: f32[224,128], index: 1, kind: input, shape index: {}]   ;;  %s3175_s2 = inlined_call_operand.vmem [shape: f32[2,1,128], index: 2, kind: input, shape index: {}]   ;;  %s3176_s3 = inlined_call_operand.hbm [shape: f32[32,128], index: 3, kind: input, shape index: {}]   ;;  %s3177_s4 = inlined_call_operand.vmem [shape: f32[1,128], index: 4, kind: input, shape index: {}]   ;;  %s3178_s5 = inlined_call_operand.hbm [shape: f32[16,128], index: 5, kind: output, shape index: {}]  }
   0x1   :  { %11 = vsyncpa [#allocation6], 0 }
   0x2   :  { %12 = vsyncpa [#allocation4], 0  ;;  %s2823_s18 = smov [#allocation2]   ;;  %s2751_s22 = scalar_lea.hbm %s3174_s1, 3584 }
   0x3   :  { %s20_s19 = sshll.u32 %s2823_s18, 4  ;;  %p2752_p0 = scmp.ne.s32.totalorder %s3174_s1, %s2751_s22  ;;  %s21_s19 = int_to_ptr.vmem [resolvable:$true] %s20_s19 }
   0x4   :  { %p2755_p1 = scmp.lt.u32.totalorder %s2751_s22, %s3174_s1 }
   0x6   :  { %p2757_p2 = pnand %p2755_p1, %p2752_p0 }
   0x8   :  { %2760 = shalt.err (!%p2757_p2)
}
   0x9   :  { %s2761_s27 = scalar_lea.vmem %s21_s19, 3584  ;;  %p2766_p4 = scmp.lt.s32.totalorder %s21_s19, %s21_s19 }
   0xa   :  { %p2762_p3 = scmp.ne.s32.totalorder %s21_s19, %s2761_s27  ;;  %p2767_p5 = scmp.lt.s32.totalorder %s2761_s27, %s2761_s27 }
   0xc   :  { %p2768_p6 = por %p2767_p5, %p2766_p4 }
   0xe   :  { %p2769_p7 = pnand %p2768_p6, %p2762_p3 }
  0x10   :  { %2772 = shalt.err (!%p2769_p7)
}
  0x11   :  { %s2824_s28 = smov 128   ;;  %s2825_s29 = smov 8  }
  0x12   :  { %26 = dma.hbm_to_vmem [thread:$0]  %s3174_s1, 3584, %s21_s19, [#allocation3], %s2824_s28, %s2824_s28, %s2825_s29  }
  0x13   :  { %s2826_s7 = smov [#allocation5]   ;;  %s2773_s11 = scalar_lea.hbm %s3176_s3, 512 }
  0x14   :  { %s34_s8 = sshll.u32 %s2826_s7, 4  ;;  %p2774_p8 = scmp.ne.s32.totalorder %s3176_s3, %s2773_s11  ;;  %s35_s8 = int_to_ptr.vmem [resolvable:$true] %s34_s8 }
  0x15   :  { %p2777_p9 = scmp.lt.u32.totalorder %s2773_s11, %s3176_s3 }
  0x17   :  { %p2779_p10 = pnand %p2777_p9, %p2774_p8 }
  0x19   :  { %2782 = shalt.err (!%p2779_p10)
}
  0x1a   :  { %s2783_s16 = scalar_lea.vmem %s35_s8, 512  ;;  %p2788_p12 = scmp.lt.s32.totalorder %s35_s8, %s35_s8 }
  0x1b   :  { %p2784_p11 = scmp.ne.s32.totalorder %s35_s8, %s2783_s16  ;;  %p2789_p13 = scmp.lt.s32.totalorder %s2783_s16, %s2783_s16 }
  0x1d   :  { %p2790_p0 = por %p2789_p13, %p2788_p12 }
  0x1f   :  { %p2791_p1 = pnand %p2790_p0, %p2784_p11 }
  0x21   :  { %2794 = shalt.err (!%p2791_p1)
}
  0x22   :  { %40 = dma.hbm_to_vmem [thread:$0]  %s3176_s3, 512, %s35_s8, [#allocation6], %s2824_s28, %s2824_s28, %s2825_s29  }
  0x23   :  { %2817 = dma.done.wait [#allocation3], 3584  }
  0x24   :  { %2818 = vsyncadd [#allocation3], 4294963712 }
  0x25   :  { %2819 = dma.done.wait [#allocation6], 512  }
  0x26   :  { %2820 = vsyncadd [#allocation6], 4294966784  ;;  %v2827_v0 = vmov 0   ;;  %v2828_v1 = vmov 0.0|0.0   ;;  %v49_v2 = vld [vmem:[%s3173_s0] sm:$0xff]  ;;  %v66_v4 = vld [vmem:[#allocation2 + $0x8] sm:$0xff]  ;;  %v51_v35 = vlaneseq }
  0x27   :  { %2622 = vset.pattern.permute.xlu0 %v2827_v0  ;;  %2498 = vmatprep.subr.bf16.mxu1 %v2828_v1  ;;  %v65_v3 = vld [vmem:[#allocation2] sm:$0xff]  ;;  %v67_v5 = vld [vmem:[#allocation2 + $0x10] sm:$0xff]  ;;  %v68_v6 = vld [vmem:[#allocation2 + $0x18] sm:$0xff]  ;;  %vm2829_vm0 = vmmov 0   ;;  %v2830_v20 = vmov 0.0   ;;  %v2831_v38 = vmov 1.0  }
  0x28   :  { %54 = vperm.xlu0 %2622, %v49_v2   ;;  %v50_v7 = vld [vmem:[%s3173_s0 + $0x8] sm:$0xff]  ;;  %v2466_v8 = vpack.c.bf16 %v66_v4, %v65_v3  ;;  %v2470_v9 = vpack.c.bf16 %v68_v6, %v67_v5  ;;  %v69_v10 = vld [vmem:[#allocation2 + $0x20] sm:$0xff]  ;;  %v83_v16 = vld [vmem:[#allocation2 + $0xb0] sm:$0xff]  ;;  %2276 = vmatprep.mubr.msk.f32.mxu1 %vm2829_vm0, %v2830_v20  ;;  %v52_v36 = vand.u32 127, %v51_v35  ;;  %s2832_s22 = smov 32   ;;  %s2833_s23 = smov 64  }
  0x29   :  { %v70_v11 = vld [vmem:[#allocation2 + $0x28] sm:$0xff]  ;;  %v81_v12 = vld [vmem:[#allocation2 + $0xa0] sm:$0xff]  ;;  %v71_v17 = vld [vmem:[#allocation2 + $0x30] sm:$0xff]  ;;  %vm167_vm3 = vcmask 261120   ;;  %vm1010_vm4 = vcmask 1041408   ;;  %vm1012_vm5 = vcmask 1043456  }
  0x2a   :  { %2467 = vmatprep.subr.bf16.mxu0 %v2466_v8  ;;  %v82_v13 = vld [vmem:[#allocation2 + $0xa8] sm:$0xff]  ;;  %v2474_v14 = vpack.c.bf16 %v70_v11, %v69_v10  ;;  %v72_v18 = vld [vmem:[#allocation2 + $0x38] sm:$0xff]  ;;  %v73_v23 = vld [vmem:[#allocation2 + $0x40] sm:$0xff]  ;;  %vm1014_vm6 = vcmask 1045504   ;;  %s2834_s27 = smov [#allocation7]  }
  0x2b   :  { %2469 = vmatpush3.bf16.msra.mxu0 %v2466_v8  ;;  %v2902_v15 = vpack.c.bf16 %v82_v13, %v81_v12  ;;  %v84_v19 = vld [vmem:[#allocation2 + $0xb8] sm:$0xff]  ;;  %v2478_v22 = vpack.c.bf16 %v72_v18, %v71_v17  ;;  %v74_v24 = vld [vmem:[#allocation2 + $0x48] sm:$0xff]  ;;  %v75_v26 = vld [vmem:[#allocation2 + $0x50] sm:$0xff]  ;;  %s2068_s30 = sshll.u32 %s2834_s27, 4  ;;  %s2069_s30 = int_to_ptr.vmem [resolvable:$true] %s2068_s30 }
  0x2c   :  { %57 = vperm.xlu0 %2622, %v50_v7   ;;  %2471 = vmatprep.subr.bf16.mxu0 %v2470_v9  ;;  %v2907_v21 = vpack.c.bf16 %v84_v19, %v83_v16  ;;  %v2482_v25 = vpack.c.bf16 %v74_v24, %v73_v23  ;;  %v76_v27 = vld [vmem:[#allocation2 + $0x58] sm:$0xff]  ;;  %v77_v29 = vld [vmem:[#allocation2 + $0x60] sm:$0xff]  ;;  %v78_v30 = vld [vmem:[#allocation2 + $0x68] sm:$0xff]  ;;  %s2795_s6 = scalar_lea.vmem %s2069_s30, 256  ;;  %p2800_p3 = scmp.lt.s32.totalorder %s2069_s30, %s2069_s30 }
  0x2d   :  { %2500 = vmatpush3.bf16.msra.mxu1 %v2902_v15  ;;  %v2486_v28 = vpack.c.bf16 %v76_v27, %v75_v26  ;;  %v2490_v31 = vpack.c.bf16 %v78_v30, %v77_v29  ;;  %v79_v32 = vld [vmem:[#allocation2 + $0x70] sm:$0xff]  ;;  %v80_v33 = vld [vmem:[#allocation2 + $0x78] sm:$0xff]  ;;  %v2083_v42 = vld [vmem:[%s3175_s2] ss:$0 sm:$0xff]  ;;  %p2796_p2 = scmp.ne.s32.totalorder %s2069_s30, %s2795_s6  ;;  %p2801_p4 = scmp.lt.s32.totalorder %s2795_s6, %s2795_s6 }
  0x2e   :  { %2501 = vmatprep.subr.bf16.mxu1 %v2828_v1  ;;  %v2494_v34 = vpack.c.bf16 %v80_v33, %v79_v32 }
  0x2f   :  { %2473 = vmatpush3.bf16.msra.mxu0 %v2470_v9  ;;  %p2802_p5 = por %p2801_p4, %p2800_p3 }
  0x30   :  { %2475 = vmatprep.subr.bf16.mxu0 %v2474_v14 }
  0x31   :  { %2503 = vmatpush3.bf16.msra.mxu1 %v2907_v21  ;;  %p2803_p6 = pnand %p2802_p5, %p2796_p2 }
  0x32   :  { %2504 = vmatprep.subr.bf16.mxu1 %v2828_v1 }
  0x33   :  { %2477 = vmatpush3.bf16.msra.mxu0 %v2474_v14 }
  0x34   :  { %2479 = vmatprep.subr.bf16.mxu0 %v2478_v22  ;;  %2277 = vmatmul.mubr.f32.vlgmr.msra.gmra.mrb[0].mxu1 %v2830_v20 }
  0x35   :  { %2506 = vmatpush3.bf16.msra.mxu1 %v2902_v15  ;;  %2287 = vmatprep.mubr.msk.f32.mxu1 %vm2829_vm0, %v2830_v20 }
  0x36   :  { %2507 = vmatprep.subr.bf16.mxu1 %v2828_v1 }
  0x37   :  { %2481 = vmatpush3.bf16.msra.mxu0 %v2478_v22 }
  0x38   :  { %2483 = vmatprep.subr.bf16.mxu0 %v2482_v25 }
  0x39   :  { %2509 = vmatpush3.bf16.msra.mxu1 %v2907_v21 }
  0x3a   :  { %2510 = vmatprep.subr.bf16.mxu1 %v2828_v1 }
  0x3b   :  { %2485 = vmatpush3.bf16.msra.mxu0 %v2482_v25 }
  0x3c   :  { %2487 = vmatprep.subr.bf16.mxu0 %v2486_v28 }
  0x3f   :  { %2489 = vmatpush3.bf16.msra.mxu0 %v2486_v28 }
  0x40   :  { %2491 = vmatprep.subr.bf16.mxu0 %v2490_v31 }
  0x43   :  { %2493 = vmatpush3.bf16.msra.mxu0 %v2490_v31 }
  0x44   :  { %2495 = vmatprep.subr.bf16.mxu0 %v2494_v34 }
  0x47   :  { %2497 = vmatpush3.bf16.msra.mxu0 %v2494_v34 }
  0x48   :  { %2522 = vmatprep.subr.bf16.mxu0 %v2828_v1 }
  0xa7   :  { %v55_v37 = vpop.permute.xlu0 %54 }
  0xa8   :  { %vm59_vm1 = vcmp.eq.s32.totalorder %v55_v37, %v52_v36 }
  0xa9   :  { %2265 = vmatprep.mubr.msk.f32.mxu0 %vm59_vm1, %v2831_v38 }
  0xab   :  { %v58_v39 = vpop.permute.xlu0 %57 }
  0xac   :  { %vm60_vm2 = vcmp.eq.s32.totalorder %v58_v39, %v52_v36 }
  0xad   :  { %2266 = vmatmul.mubr.msk.f32.vlgmr.msra.gmra.mrb[0].mxu0 %vm60_vm2, %v2831_v38 }
  0xae   :  { %2524 = vmatpush3.bf16.msra.mxu0 %v2902_v15  ;;  %2320 = vmatprep.mubr.msk.f32.mxu0 %vm2829_vm0, %v2830_v20 }
  0xaf   :  { %2525 = vmatprep.subr.bf16.mxu0 %v2828_v1 }
  0xb2   :  { %2527 = vmatpush3.bf16.msra.mxu0 %v2907_v21 }
  0xb3   :  { %2534 = vmatprep.subr.bf16.mxu0 %v2828_v1 }
 0x107   :  { %v237_v40 = vpop.f32.mrb[0].mxu1 }
 0x108   :  { %v2278_v41 = vpop.f32.mrb[1].mxu1 }
 0x180   :  { %v2267_v43 = vpop.f32.mrb[0].mxu0 }
 0x181   :  { %v2929_v44 = vadd.f32 %v2267_v43, %v2083_v42  ;;  %v158_v45 = vpop.f32.mrb[1].mxu0 }
 0x182   :  { %v2931_v46 = vadd.f32 %v2083_v42, %v158_v45 }
 0x184   :  { %v241_v47 = vadd.f32 %v237_v40, %v2931_v46 }
 0x186   :  { %2623 = vtanh.f32 %v241_v47  ;;  %v2086_v49 = vmul.f32 -1.442695, %v241_v47 }
 0x188   :  { %2625 = vpow2.f32 %v2086_v49 }
 0x190   :  { %v2624_v48 = vpop.eup %2623 }
 0x191   :  { %251 = vrot.lane.b32.xlu1 %v2624_v48, %s2832_s22 }
 0x192   :  { %v2626_v50 = vpop.eup %2625 }
 0x193   :  { %v245_v51 = vadd.f32 1.0, %v2626_v50 }
 0x195   :  { %2627 = vrcp.f32 %v245_v51 }
 0x19f   :  { %v2628_v52 = vpop.eup %2627 }
 0x1a0   :  { %v249_v55 = vmul.f32 0.0, %v2628_v52 }
 0x203   :  { %v252_v53 = vpop.permute.xlu1 %251 }
 0x204   :  { %v254_v54 = vmul.f32 %v2628_v52, %v252_v53 }
 0x206   :  { %256 = vrot.lane.b32.xlu1 %v254_v54, %s2832_s22 }
 0x278   :  { %v257_v56 = vpop.permute.xlu1 %256 }
 0x279   :  { %v259_v57 = vadd.f32 %v257_v56, %v249_v55 }
 0x27b   :  { %2629 = vtanh.f32 %v259_v57  ;;  %v353_v10 = vrot.slane %v259_v57, 6 }
 0x285   :  { %v2630_v58 = vpop.eup %2629 }
 0x286   :  { %262 = vrot.lane.b32.xlu0 %v2630_v58, %s2832_s22 }
 0x2f8   :  { %v263_v59 = vpop.permute.xlu0 %262 }
 0x2f9   :  { %v2937_v60 = vmul.f32 %v2628_v52, %v263_v59 }
 0x2fb   :  { %267 = vrot.lane.b32.xlu1 %v2937_v60, %s2833_s23 }
 0x36d   :  { %v268_v61 = vpop.permute.xlu1 %267 }
 0x36e   :  { %2288 = vmatmul.mubr.msk.f32.vlgmr.msra.gmra.mrb[2].mxu1 %vm167_vm3, %v268_v61 }
 0x36f   :  { %2512 = vmatpush3.bf16.msra.mxu1 %v2902_v15  ;;  %2298 = vmatprep.mubr.msk.f32.mxu1 %vm2829_vm0, %v2830_v20 }
 0x370   :  { %2513 = vmatprep.subr.bf16.mxu1 %v2828_v1 }
 0x373   :  { %2515 = vmatpush3.bf16.msra.mxu1 %v2907_v21 }
 0x374   :  { %2516 = vmatprep.subr.bf16.mxu1 %v2828_v1 }
 0x441   :  { %v337_v62 = vpop.f32.mrb[2].mxu1 }
 0x442   :  { %v342_v63 = vrot.slane %v337_v62, 6  ;;  %v2289_v0 = vpop.f32.mrb[3].mxu1 }
 0x444   :  { %v344_v2 = vadd.f32 %v342_v63, %v2931_v46 }
 0x446   :  { %2631 = vtanh.f32 %v344_v2  ;;  %v2088_v4 = vmul.f32 -1.442695, %v344_v2 }
 0x448   :  { %2633 = vpow2.f32 %v2088_v4 }
 0x450   :  { %v2632_v3 = vpop.eup %2631 }
 0x451   :  { %357 = vrot.lane.b32.xlu0 %v2632_v3, %s2832_s22 }
 0x452   :  { %v2634_v5 = vpop.eup %2633 }
 0x453   :  { %v348_v6 = vadd.f32 1.0, %v2634_v5 }
 0x455   :  { %2635 = vrcp.f32 %v348_v6 }
 0x45f   :  { %v2636_v7 = vpop.eup %2635 }
 0x460   :  { %v355_v11 = vmul.f32 %v2636_v7, %v353_v10 }
 0x4c3   :  { %v358_v8 = vpop.permute.xlu0 %357 }
 0x4c4   :  { %v360_v9 = vmul.f32 %v2636_v7, %v358_v8 }
 0x4c6   :  { %362 = vrot.lane.b32.xlu1 %v360_v9, %s2832_s22 }
 0x538   :  { %v363_v12 = vpop.permute.xlu1 %362 }
 0x539   :  { %v365_v13 = vadd.f32 %v363_v12, %v355_v11 }
 0x53b   :  { %2637 = vtanh.f32 %v365_v13  ;;  %v460_v33 = vrot.slane %v365_v13, 6 }
 0x545   :  { %v2638_v14 = vpop.eup %2637 }
 0x546   :  { %368 = vrot.lane.b32.xlu0 %v2638_v14, %s2832_s22 }
 0x5b8   :  { %v369_v16 = vpop.permute.xlu0 %368 }
 0x5b9   :  { %v371_v17 = vmul.f32 %v2636_v7, %v369_v16 }
 0x5bb   :  { %v373_v18 = vrot.slane %v371_v17, 2  ;;  %v1011_v40 = vsel %vm1010_vm4, %v2937_v60, %v371_v17 }
 0x5bd   :  { %374 = vrot.lane.b32.xlu1 %v373_v18, %s2833_s23 }
 0x62f   :  { %v375_v19 = vpop.permute.xlu1 %374 }
 0x630   :  { %2299 = vmatmul.mubr.msk.f32.vlgmr.msra.gmra.mrb[4].mxu1 %vm167_vm3, %v375_v19 }
 0x631   :  { %2518 = vmatpush3.bf16.msra.mxu1 %v2902_v15  ;;  %2309 = vmatprep.mubr.msk.f32.mxu1 %vm2829_vm0, %v2830_v20 }
 0x632   :  { %2519 = vmatprep.subr.bf16.mxu1 %v2828_v1 }
 0x635   :  { %2521 = vmatpush3.bf16.msra.mxu1 %v2907_v21 }
 0x636   :  { %2528 = vmatprep.subr.bf16.mxu1 %v2828_v1 }
 0x703   :  { %v444_v22 = vpop.f32.mrb[4].mxu1 }
 0x704   :  { %v449_v23 = vrot.slane %v444_v22, 4  ;;  %v2300_v24 = vpop.f32.mrb[5].mxu1 }
 0x706   :  { %v451_v25 = vadd.f32 %v449_v23, %v2931_v46 }
 0x708   :  { %2639 = vtanh.f32 %v451_v25  ;;  %v2090_v27 = vmul.f32 -1.442695, %v451_v25 }
 0x70a   :  { %2641 = vpow2.f32 %v2090_v27 }
 0x712   :  { %v2640_v26 = vpop.eup %2639 }
 0x713   :  { %464 = vrot.lane.b32.xlu0 %v2640_v26, %s2832_s22 }
 0x714   :  { %v2642_v28 = vpop.eup %2641 }
 0x715   :  { %v455_v29 = vadd.f32 1.0, %v2642_v28 }
 0x717   :  { %2643 = vrcp.f32 %v455_v29 }
 0x721   :  { %v2644_v30 = vpop.eup %2643 }
 0x722   :  { %v462_v34 = vmul.f32 %v2644_v30, %v460_v33 }
 0x785   :  { %v465_v31 = vpop.permute.xlu0 %464 }
 0x786   :  { %v467_v32 = vmul.f32 %v2644_v30, %v465_v31 }
 0x788   :  { %469 = vrot.lane.b32.xlu1 %v467_v32, %s2832_s22 }
 0x7fa   :  { %v470_v35 = vpop.permute.xlu1 %469 }
 0x7fb   :  { %v472_v36 = vadd.f32 %v470_v35, %v462_v34 }
 0x7fd   :  { %2645 = vtanh.f32 %v472_v36  ;;  %v567_v57 = vrot.slane %v472_v36, 6 }
 0x807   :  { %v2646_v37 = vpop.eup %2645 }
 0x808   :  { %475 = vrot.lane.b32.xlu0 %v2646_v37, %s2832_s22 }
 0x87a   :  { %v476_v38 = vpop.permute.xlu0 %475 }
 0x87b   :  { %v478_v39 = vmul.f32 %v2644_v30, %v476_v38 }
 0x87d   :  { %v480_v41 = vrot.slane %v478_v39, 4  ;;  %v1013_v42 = vsel %vm1012_vm5, %v1011_v40, %v478_v39 }
 0x87f   :  { %481 = vrot.lane.b32.xlu1 %v480_v41, %s2833_s23 }
 0x8f1   :  { %v482_v43 = vpop.permute.xlu1 %481 }
 0x8f2   :  { %2310 = vmatmul.mubr.msk.f32.vlgmr.msra.gmra.mrb[6].mxu1 %vm167_vm3, %v482_v43 }
 0x8f3   :  { %2530 = vmatpush3.bf16.msra.mxu1 %v2902_v15  ;;  %2331 = vmatprep.mubr.msk.f32.mxu1 %vm2829_vm0, %v2830_v20 }
 0x8f4   :  { %2531 = vmatprep.subr.bf16.mxu1 %v2828_v1 }
 0x8f7   :  { %2533 = vmatpush3.bf16.msra.mxu1 %v2907_v21 }
 0x8f8   :  { %2540 = vmatprep.subr.bf16.mxu1 %v2828_v1 }
 0x9c5   :  { %v551_v45 = vpop.f32.mrb[6].mxu1 }
 0x9c6   :  { %v556_v47 = vrot.slane %v551_v45, 2  ;;  %v2311_v48 = vpop.f32.mrb[7].mxu1 }
 0x9c8   :  { %v558_v49 = vadd.f32 %v556_v47, %v2931_v46 }
 0x9ca   :  { %2647 = vtanh.f32 %v558_v49  ;;  %v2092_v51 = vmul.f32 -1.442695, %v558_v49 }
 0x9cc   :  { %2649 = vpow2.f32 %v2092_v51 }
 0x9d4   :  { %v2648_v50 = vpop.eup %2647 }
 0x9d5   :  { %571 = vrot.lane.b32.xlu0 %v2648_v50, %s2832_s22 }
 0x9d6   :  { %v2650_v52 = vpop.eup %2649 }
 0x9d7   :  { %v562_v53 = vadd.f32 1.0, %v2650_v52 }
 0x9d9   :  { %2651 = vrcp.f32 %v562_v53 }
 0x9e3   :  { %v2652_v54 = vpop.eup %2651 }
 0x9e4   :  { %v569_v58 = vmul.f32 %v2652_v54, %v567_v57 }
 0xa47   :  { %v572_v55 = vpop.permute.xlu0 %571 }
 0xa48   :  { %v574_v56 = vmul.f32 %v2652_v54, %v572_v55 }
 0xa4a   :  { %576 = vrot.lane.b32.xlu1 %v574_v56, %s2832_s22 }
 0xabc   :  { %v577_v59 = vpop.permute.xlu1 %576 }
 0xabd   :  { %v579_v60 = vadd.f32 %v577_v59, %v569_v58 }
 0xabf   :  { %2653 = vtanh.f32 %v579_v60  ;;  %v671_v13 = vrot.slane %v579_v60, 6 }
 0xac9   :  { %v2654_v46 = vpop.eup %2653 }
 0xaca   :  { %582 = vrot.lane.b32.xlu0 %v2654_v46, %s2832_s22 }
 0xb3c   :  { %v583_v61 = vpop.permute.xlu0 %582 }
 0xb3d   :  { %v585_v62 = vmul.f32 %v2652_v54, %v583_v61 }
 0xb3f   :  { %v587_v63 = vrot.slane %v585_v62, 6  ;;  %v2980_v0 = vsel %vm1014_vm6, %v1013_v42, %v585_v62 }
 0xb41   :  { %588 = vrot.lane.b32.xlu1 %v587_v63, %s2833_s23 }
 0xbb3   :  { %v589_v2 = vpop.permute.xlu1 %588 }
 0xbb4   :  { %2321 = vmatmul.mubr.msk.f32.vlgmr.msra.gmra.mrb[2].mxu0 %vm167_vm3, %v589_v2 }
 0xbb5   :  { %2536 = vmatpush3.bf16.msra.mxu0 %v2902_v15  ;;  %2342 = vmatprep.mubr.msk.f32.mxu0 %vm2829_vm0, %v2830_v20 }
 0xbb6   :  { %2537 = vmatprep.subr.bf16.mxu0 %v2828_v1 }
 0xbb9   :  { %2539 = vmatpush3.bf16.msra.mxu0 %v2907_v21 }
 0xc87   :  { %v658_v3 = vpop.f32.mrb[2].mxu0 }
 0xc88   :  { %v662_v4 = vadd.f32 %v658_v3, %v2929_v44  ;;  %v2322_v5 = vpop.f32.mrb[3].mxu0 }
 0xc8a   :  { %2655 = vtanh.f32 %v662_v4  ;;  %v2094_v7 = vmul.f32 -1.442695, %v662_v4 }
 0xc8c   :  { %2657 = vpow2.f32 %v2094_v7 }
 0xc94   :  { %v2656_v6 = vpop.eup %2655 }
 0xc95   :  { %675 = vrot.lane.b32.xlu0 %v2656_v6, %s2832_s22 }
 0xc96   :  { %v2658_v8 = vpop.eup %2657 }
 0xc97   :  { %v666_v9 = vadd.f32 1.0, %v2658_v8 }
 0xc99   :  { %2659 = vrcp.f32 %v666_v9 }
 0xca3   :  { %v2660_v10 = vpop.eup %2659 }
 0xca4   :  { %v673_v14 = vmul.f32 %v2660_v10, %v671_v13 }
 0xd07   :  { %v676_v11 = vpop.permute.xlu0 %675 }
 0xd08   :  { %v678_v12 = vmul.f32 %v2660_v10, %v676_v11 }
 0xd0a   :  { %680 = vrot.lane.b32.xlu1 %v678_v12, %s2832_s22 }
 0xd7c   :  { %v681_v16 = vpop.permute.xlu1 %680 }
 0xd7d   :  { %v683_v17 = vadd.f32 %v681_v16, %v673_v14 }
 0xd7f   :  { %2661 = vtanh.f32 %v683_v17 }
 0xd89   :  { %v2662_v18 = vpop.eup %2661 }
 0xd8a   :  { %686 = vrot.lane.b32.xlu0 %v2662_v18, %s2832_s22 }
 0xdfc   :  { %v687_v19 = vpop.permute.xlu0 %686 }
 0xdfd   :  { %v2993_v22 = vmul.f32 %v2660_v10, %v687_v19  ;;  %v1019_v19 = vld [vmem:[#allocation2 + $0x80] sm:$0xff] }
 0xdff   :  { %691 = vrot.lane.b32.xlu1 %v2993_v22, %s2833_s23 }
 0xe71   :  { %v692_v23 = vpop.permute.xlu1 %691 }
 0xe72   :  { %2332 = vmatmul.mubr.msk.f32.vlgmr.msra.gmra.mrb[8].mxu1 %vm167_vm3, %v692_v23  ;;  %v1023_v23 = vld [vmem:[#allocation2 + $0xc0] sm:$0xff] }
 0xe73   :  { %2542 = vmatpush3.bf16.msra.mxu1 %v2902_v15  ;;  %2353 = vmatprep.mubr.msk.f32.mxu1 %vm2829_vm0, %v2830_v20 }
 0xe74   :  { %2543 = vmatprep.subr.bf16.mxu1 %v2828_v1 }
 0xe77   :  { %2545 = vmatpush3.bf16.msra.mxu1 %v2907_v21  ;;  %v777_v21 = vrot.slane %v683_v17, 6 }
 0xe78   :  { %2554 = vmatprep.subr.bf16.mxu1 %v2828_v1 }
 0xf45   :  { %v761_v24 = vpop.f32.mrb[8].mxu1 }
 0xf46   :  { %v766_v25 = vrot.slane %v761_v24, 6  ;;  %v2333_v26 = vpop.f32.mrb[9].mxu1 }
 0xf47   :  { %v1021_v26 = vld [vmem:[#allocation2 + $0x90] sm:$0xff] }
 0xf48   :  { %v768_v27 = vadd.f32 %v766_v25, %v2929_v44  ;;  %v1024_v25 = vld [vmem:[#allocation2 + $0xc8] sm:$0xff] }
 0xf4a   :  { %2663 = vtanh.f32 %v768_v27  ;;  %v2096_v29 = vmul.f32 -1.442695, %v768_v27  ;;  %v1022_v27 = vld [vmem:[#allocation2 + $0x98] sm:$0xff] }
 0xf4c   :  { %2665 = vpow2.f32 %v2096_v29  ;;  %v2550_v29 = vpack.c.bf16 %v1022_v27, %v1021_v26 }
 0xf54   :  { %v2664_v28 = vpop.eup %2663 }
 0xf55   :  { %781 = vrot.lane.b32.xlu0 %v2664_v28, %s2832_s22  ;;  %v3027_v28 = vpack.c.bf16 %v1024_v25, %v1023_v23 }
 0xf56   :  { %v2666_v15 = vpop.eup %2665 }
 0xf57   :  { %v772_v30 = vadd.f32 1.0, %v2666_v15  ;;  %v1025_v15 = vld [vmem:[#allocation2 + $0xd0] sm:$0xff] }
 0xf59   :  { %2667 = vrcp.f32 %v772_v30 }
 0xf63   :  { %v2668_v31 = vpop.eup %2667 }
 0xf64   :  { %v779_v34 = vmul.f32 %v2668_v31, %v777_v21 }
 0xfc7   :  { %v782_v32 = vpop.permute.xlu0 %781 }
 0xfc8   :  { %v784_v33 = vmul.f32 %v2668_v31, %v782_v32 }
 0xfca   :  { %786 = vrot.lane.b32.xlu1 %v784_v33, %s2832_s22 }
0x103c   :  { %v787_v35 = vpop.permute.xlu1 %786 }
0x103d   :  { %v789_v36 = vadd.f32 %v787_v35, %v779_v34 }
0x103f   :  { %2669 = vtanh.f32 %v789_v36  ;;  %v884_v55 = vrot.slane %v789_v36, 6 }
0x1049   :  { %v2670_v37 = vpop.eup %2669 }
0x104a   :  { %792 = vrot.lane.b32.xlu0 %v2670_v37, %s2832_s22  ;;  %v2102_v37 = vld [vmem:[%s3175_s2 + $0x1] ss:$0 sm:$0xff] }
0x10bc   :  { %v793_v38 = vpop.permute.xlu0 %792 }
0x10bd   :  { %v795_v39 = vmul.f32 %v2668_v31, %v793_v38 }
0x10bf   :  { %v797_v40 = vrot.slane %v795_v39, 2  ;;  %v1016_v61 = vsel %vm1010_vm4, %v2993_v22, %v795_v39  ;;  %v1020_v22 = vld [vmem:[#allocation2 + $0x88] sm:$0xff] }
0x10c0   :  { %v2546_v24 = vpack.c.bf16 %v1020_v22, %v1019_v19 }
0x10c1   :  { %798 = vrot.lane.b32.xlu1 %v797_v40, %s2833_s23 }
0x10c2   :  { %2547 = vmatprep.subr.bf16.mxu0 %v2546_v24 }
0x1133   :  { %v799_v41 = vpop.permute.xlu1 %798 }
0x1134   :  { %2343 = vmatmul.mubr.msk.f32.vlgmr.msra.gmra.mrb[4].mxu0 %vm167_vm3, %v799_v41 }
0x1135   :  { %2549 = vmatpush3.bf16.msra.mxu0 %v2546_v24 }
0x1136   :  { %2551 = vmatprep.subr.bf16.mxu0 %v2550_v29 }
0x1139   :  { %2553 = vmatpush3.bf16.msra.mxu0 %v2550_v29 }
0x113a   :  { %2560 = vmatprep.subr.bf16.mxu0 %v2828_v1 }
0x1207   :  { %v868_v42 = vpop.f32.mrb[4].mxu0 }
0x1208   :  { %v873_v43 = vrot.slane %v868_v42, 4  ;;  %v2344_v45 = vpop.f32.mrb[5].mxu0 }
0x120a   :  { %v875_v47 = vadd.f32 %v873_v43, %v2929_v44 }
0x120c   :  { %2671 = vtanh.f32 %v875_v47  ;;  %v2098_v49 = vmul.f32 -1.442695, %v875_v47 }
0x120e   :  { %2673 = vpow2.f32 %v2098_v49 }
0x1216   :  { %v2672_v48 = vpop.eup %2671 }
0x1217   :  { %888 = vrot.lane.b32.xlu0 %v2672_v48, %s2832_s22 }
0x1218   :  { %v2674_v50 = vpop.eup %2673 }
0x1219   :  { %v879_v51 = vadd.f32 1.0, %v2674_v50 }
0x121b   :  { %2675 = vrcp.f32 %v879_v51 }
0x1225   :  { %v2676_v52 = vpop.eup %2675 }
0x1226   :  { %v886_v56 = vmul.f32 %v2676_v52, %v884_v55 }
0x1289   :  { %v889_v53 = vpop.permute.xlu0 %888 }
0x128a   :  { %v891_v54 = vmul.f32 %v2676_v52, %v889_v53 }
0x128c   :  { %893 = vrot.lane.b32.xlu1 %v891_v54, %s2832_s22 }
0x12fe   :  { %v894_v57 = vpop.permute.xlu1 %893 }
0x12ff   :  { %v896_v58 = vadd.f32 %v894_v57, %v886_v56 }
0x1301   :  { %2677 = vtanh.f32 %v896_v58  ;;  %v991_v14 = vrot.slane %v896_v58, 6 }
0x130b   :  { %v2678_v59 = vpop.eup %2677 }
0x130c   :  { %899 = vrot.lane.b32.xlu0 %v2678_v59, %s2832_s22 }
0x137e   :  { %v900_v60 = vpop.permute.xlu0 %899 }
0x137f   :  { %v902_v46 = vmul.f32 %v2676_v52, %v900_v60 }
0x1381   :  { %v904_v62 = vrot.slane %v902_v46, 4  ;;  %v1017_v63 = vsel %vm1012_vm5, %v1016_v61, %v902_v46 }
0x1383   :  { %905 = vrot.lane.b32.xlu1 %v904_v62, %s2833_s23 }
0x13f5   :  { %v906_v2 = vpop.permute.xlu1 %905 }
0x13f6   :  { %2354 = vmatmul.mubr.msk.f32.vlgmr.msra.gmra.mrb[10].mxu1 %vm167_vm3, %v906_v2 }
0x13f7   :  { %2375 = vmatprep.mubr.msk.f32.mxu1 %vm2829_vm0, %v2830_v20  ;;  %2556 = vmatpush3.bf16.msra.mxu1 %v3027_v28 }
0x13f8   :  { %2557 = vmatprep.subr.bf16.mxu1 %v2828_v1 }
0x14c9   :  { %v975_v3 = vpop.f32.mrb[10].mxu1 }
0x14ca   :  { %v980_v4 = vrot.slane %v975_v3, 2  ;;  %v2355_v5 = vpop.f32.mrb[11].mxu1 }
0x14cc   :  { %v982_v6 = vadd.f32 %v980_v4, %v2929_v44 }
0x14ce   :  { %2679 = vtanh.f32 %v982_v6  ;;  %v2100_v8 = vmul.f32 -1.442695, %v982_v6 }
0x14d0   :  { %2681 = vpow2.f32 %v2100_v8 }
0x14d8   :  { %v2680_v7 = vpop.eup %2679 }
0x14d9   :  { %995 = vrot.lane.b32.xlu0 %v2680_v7, %s2832_s22 }
0x14da   :  { %v2682_v9 = vpop.eup %2681 }
0x14db   :  { %v986_v10 = vadd.f32 1.0, %v2682_v9 }
0x14dd   :  { %2683 = vrcp.f32 %v986_v10 }
0x14e7   :  { %v2684_v11 = vpop.eup %2683 }
0x14e8   :  { %v993_v16 = vmul.f32 %v2684_v11, %v991_v14 }
0x154b   :  { %v996_v12 = vpop.permute.xlu0 %995 }
0x154c   :  { %v998_v13 = vmul.f32 %v2684_v11, %v996_v12 }
0x154e   :  { %1000 = vrot.lane.b32.xlu1 %v998_v13, %s2832_s22 }
0x1552   :  { %1037 = vrot.lane.b32.xlu1 %v2980_v0, %s2833_s23  ;;  %v1026_v0 = vld [vmem:[#allocation2 + $0xd8] sm:$0xff] }
0x1553   :  { %v3030_v30 = vpack.c.bf16 %v1026_v0, %v1025_v15 }
0x1555   :  { %2559 = vmatpush3.bf16.msra.mxu1 %v3030_v30 }
0x1556   :  { %2566 = vmatprep.subr.bf16.mxu1 %v2828_v1 }
0x1558   :  { %2376 = vmatmul.mubr.f32.vlgmr.msra.gmra.mrb[12].mxu1 %v2830_v20 }
0x1559   :  { %2568 = vmatpush3.bf16.msra.mxu1 %v3027_v28  ;;  %2397 = vmatprep.mubr.msk.f32.mxu1 %vm2829_vm0, %v2830_v20 }
0x155a   :  { %2569 = vmatprep.subr.bf16.mxu1 %v2828_v1 }
0x155d   :  { %2571 = vmatpush3.bf16.msra.mxu1 %v3030_v30 }
0x155e   :  { %2578 = vmatprep.subr.bf16.mxu1 %v2828_v1 }
0x15c0   :  { %v1001_v44 = vpop.permute.xlu1 %1000 }
0x15c1   :  { %v1003_v17 = vadd.f32 %v1001_v44, %v993_v16 }
0x15c3   :  { %2685 = vtanh.f32 %v1003_v17 }
0x15c4   :  { %v1038_v18 = vpop.permute.xlu1 %1037 }
0x15c5   :  { %2364 = vmatprep.mubr.msk.f32.mxu0 %vm167_vm3, %v1038_v18 }
0x15cd   :  { %v2686_v31 = vpop.eup %2685 }
0x15ce   :  { %1006 = vrot.lane.b32.xlu0 %v2686_v31, %s2832_s22 }
0x162b   :  { %v1186_v35 = vpop.f32.mrb[12].mxu1 }
0x162c   :  { %v2377_v36 = vpop.f32.mrb[13].mxu1 }
0x1640   :  { %v1007_v32 = vpop.permute.xlu0 %1006 }
0x1641   :  { %v1009_v33 = vmul.f32 %v2684_v11, %v1007_v32 }
0x1643   :  { %v1018_v21 = vsel %vm1014_vm6, %v1017_v63, %v1009_v33 }
0x1644   :  { %1039 = vrot.lane.b32.xlu0 %v1018_v21, %s2833_s23 }
0x16b6   :  { %v1040_v34 = vpop.permute.xlu0 %1039 }
0x16b7   :  { %2365 = vmatmul.mubr.msk.f32.vlgmr.msra.gmra.mrb[6].mxu0 %vm167_vm3, %v1040_v34 }
0x16b8   :  { %2562 = vmatpush3.bf16.msra.mxu0 %v3027_v28  ;;  %2386 = vmatprep.mubr.msk.f32.mxu0 %vm2829_vm0, %v2830_v20 }
0x16b9   :  { %2563 = vmatprep.subr.bf16.mxu0 %v2828_v1 }
0x16bc   :  { %2565 = vmatpush3.bf16.msra.mxu0 %v3030_v30 }
0x16bd   :  { %2572 = vmatprep.subr.bf16.mxu0 %v2828_v1 }
0x178a   :  { %v2366_v38 = vpop.f32.mrb[6].mxu0 }
0x178b   :  { %v3056_v39 = vadd.f32 %v2366_v38, %v2102_v37  ;;  %v1111_v40 = vpop.f32.mrb[7].mxu0 }
0x178c   :  { %v3058_v41 = vadd.f32 %v2102_v37, %v1111_v40 }
0x178e   :  { %v1190_v42 = vadd.f32 %v1186_v35, %v3058_v41 }
0x1790   :  { %2687 = vtanh.f32 %v1190_v42  ;;  %v2105_v45 = vmul.f32 -1.442695, %v1190_v42 }
0x1792   :  { %2689 = vpow2.f32 %v2105_v45 }
0x179a   :  { %v2688_v43 = vpop.eup %2687 }
0x179b   :  { %1200 = vrot.lane.b32.xlu1 %v2688_v43, %s2832_s22 }
0x179c   :  { %v2690_v47 = vpop.eup %2689 }
0x179d   :  { %v1194_v48 = vadd.f32 1.0, %v2690_v47 }
0x179f   :  { %2691 = vrcp.f32 %v1194_v48 }
0x17a9   :  { %v2692_v49 = vpop.eup %2691 }
0x17aa   :  { %v1198_v52 = vmul.f32 0.0, %v2692_v49 }
0x180d   :  { %v1201_v50 = vpop.permute.xlu1 %1200 }
0x180e   :  { %v1203_v51 = vmul.f32 %v2692_v49, %v1201_v50 }
0x1810   :  { %1205 = vrot.lane.b32.xlu0 %v1203_v51, %s2832_s22 }
0x1882   :  { %v1206_v53 = vpop.permute.xlu0 %1205 }
0x1883   :  { %v1208_v54 = vadd.f32 %v1206_v53, %v1198_v52 }
0x1885   :  { %2693 = vtanh.f32 %v1208_v54  ;;  %v1302_v7 = vrot.slane %v1208_v54, 6 }
0x188f   :  { %v2694_v55 = vpop.eup %2693 }
0x1890   :  { %1211 = vrot.lane.b32.xlu1 %v2694_v55, %s2832_s22 }
0x1902   :  { %v1212_v56 = vpop.permute.xlu1 %1211 }
0x1903   :  { %v3064_v57 = vmul.f32 %v2692_v49, %v1212_v56 }
0x1905   :  { %1216 = vrot.lane.b32.xlu0 %v3064_v57, %s2833_s23 }
0x1977   :  { %v1217_v58 = vpop.permute.xlu0 %1216 }
0x1978   :  { %2387 = vmatmul.mubr.msk.f32.vlgmr.msra.gmra.mrb[8].mxu0 %vm167_vm3, %v1217_v58 }
0x1979   :  { %2574 = vmatpush3.bf16.msra.mxu0 %v3027_v28  ;;  %2408 = vmatprep.mubr.msk.f32.mxu0 %vm2829_vm0, %v2830_v20 }
0x197a   :  { %2575 = vmatprep.subr.bf16.mxu0 %v2828_v1 }
0x197d   :  { %2577 = vmatpush3.bf16.msra.mxu0 %v3030_v30 }
0x197e   :  { %2584 = vmatprep.subr.bf16.mxu0 %v2828_v1 }
0x1a4b   :  { %v1286_v59 = vpop.f32.mrb[8].mxu0 }
0x1a4c   :  { %v1291_v60 = vrot.slane %v1286_v59, 6  ;;  %v2388_v46 = vpop.f32.mrb[9].mxu0 }
0x1a4e   :  { %v1293_v61 = vadd.f32 %v1291_v60, %v3058_v41 }
0x1a50   :  { %2695 = vtanh.f32 %v1293_v61  ;;  %v2107_v63 = vmul.f32 -1.442695, %v1293_v61 }
0x1a52   :  { %2697 = vpow2.f32 %v2107_v63 }
0x1a5a   :  { %v2696_v62 = vpop.eup %2695 }
0x1a5b   :  { %1306 = vrot.lane.b32.xlu1 %v2696_v62, %s2832_s22 }
0x1a5c   :  { %v2698_v2 = vpop.eup %2697 }
0x1a5d   :  { %v1297_v3 = vadd.f32 1.0, %v2698_v2 }
0x1a5f   :  { %2699 = vrcp.f32 %v1297_v3 }
0x1a69   :  { %v2700_v4 = vpop.eup %2699 }
0x1a6a   :  { %v1304_v8 = vmul.f32 %v2700_v4, %v1302_v7 }
0x1acd   :  { %v1307_v5 = vpop.permute.xlu1 %1306 }
0x1ace   :  { %v1309_v6 = vmul.f32 %v2700_v4, %v1307_v5 }
0x1ad0   :  { %1311 = vrot.lane.b32.xlu0 %v1309_v6, %s2832_s22 }
0x1b42   :  { %v1312_v9 = vpop.permute.xlu0 %1311 }
0x1b43   :  { %v1314_v10 = vadd.f32 %v1312_v9, %v1304_v8 }
0x1b45   :  { %2701 = vtanh.f32 %v1314_v10  ;;  %v1409_v15 = vrot.slane %v1314_v10, 6 }
0x1b4f   :  { %v2702_v11 = vpop.eup %2701 }
0x1b50   :  { %1317 = vrot.lane.b32.xlu1 %v2702_v11, %s2832_s22 }
0x1bc2   :  { %v1318_v12 = vpop.permute.xlu1 %1317 }
0x1bc3   :  { %v1320_v13 = vmul.f32 %v2700_v4, %v1318_v12 }
0x1bc5   :  { %v1322_v14 = vrot.slane %v1320_v13, 2  ;;  %v1959_v35 = vsel %vm1010_vm4, %v3064_v57, %v1320_v13 }
0x1bc7   :  { %1323 = vrot.lane.b32.xlu0 %v1322_v14, %s2833_s23 }
0x1c39   :  { %v1324_v16 = vpop.permute.xlu0 %1323 }
0x1c3a   :  { %2398 = vmatmul.mubr.msk.f32.vlgmr.msra.gmra.mrb[14].mxu1 %vm167_vm3, %v1324_v16 }
0x1c3b   :  { %2580 = vmatpush3.bf16.msra.mxu1 %v3027_v28  ;;  %2419 = vmatprep.mubr.msk.f32.mxu1 %vm2829_vm0, %v2830_v20 }
0x1c3c   :  { %2581 = vmatprep.subr.bf16.mxu1 %v2828_v1 }
0x1c3f   :  { %2583 = vmatpush3.bf16.msra.mxu1 %v3030_v30 }
0x1c40   :  { %2590 = vmatprep.subr.bf16.mxu1 %v2828_v1 }
0x1d0d   :  { %v1393_v44 = vpop.f32.mrb[14].mxu1 }
0x1d0e   :  { %v1398_v17 = vrot.slane %v1393_v44, 4  ;;  %v2399_v18 = vpop.f32.mrb[15].mxu1 }
0x1d10   :  { %v1400_v19 = vadd.f32 %v1398_v17, %v3058_v41 }
0x1d12   :  { %2703 = vtanh.f32 %v1400_v19  ;;  %v2109_v23 = vmul.f32 -1.442695, %v1400_v19 }
0x1d14   :  { %2705 = vpow2.f32 %v2109_v23 }
0x1d1c   :  { %v2704_v22 = vpop.eup %2703 }
0x1d1d   :  { %1413 = vrot.lane.b32.xlu1 %v2704_v22, %s2832_s22 }
0x1d1e   :  { %v2706_v24 = vpop.eup %2705 }
0x1d1f   :  { %v1404_v25 = vadd.f32 1.0, %v2706_v24 }
0x1d21   :  { %2707 = vrcp.f32 %v1404_v25 }
0x1d2b   :  { %v2708_v26 = vpop.eup %2707 }
0x1d2c   :  { %v1411_v0 = vmul.f32 %v2708_v26, %v1409_v15 }
0x1d8f   :  { %v1414_v27 = vpop.permute.xlu1 %1413 }
0x1d90   :  { %v1416_v29 = vmul.f32 %v2708_v26, %v1414_v27 }
0x1d92   :  { %1418 = vrot.lane.b32.xlu0 %v1416_v29, %s2832_s22 }
0x1e04   :  { %v1419_v31 = vpop.permute.xlu0 %1418 }
0x1e05   :  { %v1421_v32 = vadd.f32 %v1419_v31, %v1411_v0 }
0x1e07   :  { %2709 = vtanh.f32 %v1421_v32  ;;  %v1516_v54 = vrot.slane %v1421_v32, 6 }
0x1e11   :  { %v2710_v33 = vpop.eup %2709 }
0x1e12   :  { %1424 = vrot.lane.b32.xlu1 %v2710_v33, %s2832_s22 }
0x1e84   :  { %v1425_v21 = vpop.permute.xlu1 %1424 }
0x1e85   :  { %v1427_v34 = vmul.f32 %v2708_v26, %v1425_v21 }
0x1e87   :  { %v1429_v36 = vrot.slane %v1427_v34, 4  ;;  %v1960_v37 = vsel %vm1012_vm5, %v1959_v35, %v1427_v34 }
0x1e89   :  { %1430 = vrot.lane.b32.xlu0 %v1429_v36, %s2833_s23 }
0x1efb   :  { %v1431_v38 = vpop.permute.xlu0 %1430 }
0x1efc   :  { %2409 = vmatmul.mubr.msk.f32.vlgmr.msra.gmra.mrb[10].mxu0 %vm167_vm3, %v1431_v38 }
0x1efd   :  { %2586 = vmatpush3.bf16.msra.mxu0 %v3027_v28  ;;  %2430 = vmatprep.mubr.msk.f32.mxu0 %vm2829_vm0, %v2830_v20 }
0x1efe   :  { %2587 = vmatprep.subr.bf16.mxu0 %v2828_v1 }
0x1f01   :  { %2589 = vmatpush3.bf16.msra.mxu0 %v3030_v30 }
0x1f02   :  { %2596 = vmatprep.subr.bf16.mxu0 %v2828_v1 }
0x1fcf   :  { %v1500_v40 = vpop.f32.mrb[10].mxu0 }
0x1fd0   :  { %v1505_v42 = vrot.slane %v1500_v40, 2  ;;  %v2410_v43 = vpop.f32.mrb[11].mxu0 }
0x1fd2   :  { %v1507_v45 = vadd.f32 %v1505_v42, %v3058_v41 }
0x1fd4   :  { %2711 = vtanh.f32 %v1507_v45  ;;  %v2111_v48 = vmul.f32 -1.442695, %v1507_v45 }
0x1fd6   :  { %2713 = vpow2.f32 %v2111_v48 }
0x1fde   :  { %v2712_v47 = vpop.eup %2711 }
0x1fdf   :  { %1520 = vrot.lane.b32.xlu1 %v2712_v47, %s2832_s22 }
0x1fe0   :  { %v2714_v49 = vpop.eup %2713 }
0x1fe1   :  { %v1511_v50 = vadd.f32 1.0, %v2714_v49 }
0x1fe3   :  { %2715 = vrcp.f32 %v1511_v50 }
0x1fed   :  { %v2716_v51 = vpop.eup %2715 }
0x1fee   :  { %v1518_v55 = vmul.f32 %v2716_v51, %v1516_v54 }
0x2051   :  { %v1521_v52 = vpop.permute.xlu1 %1520 }
0x2052   :  { %v1523_v53 = vmul.f32 %v2716_v51, %v1521_v52 }
0x2054   :  { %1525 = vrot.lane.b32.xlu0 %v1523_v53, %s2832_s22 }
0x20c6   :  { %v1526_v56 = vpop.permute.xlu0 %1525 }
0x20c7   :  { %v1528_v57 = vadd.f32 %v1526_v56, %v1518_v55 }
0x20c9   :  { %2717 = vtanh.f32 %v1528_v57  ;;  %v1620_v10 = vrot.slane %v1528_v57, 6 }
0x20d3   :  { %v2718_v41 = vpop.eup %2717 }
0x20d4   :  { %1531 = vrot.lane.b32.xlu1 %v2718_v41, %s2832_s22 }
0x2146   :  { %v1532_v58 = vpop.permute.xlu1 %1531 }
0x2147   :  { %v1534_v59 = vmul.f32 %v2716_v51, %v1532_v58 }
0x2149   :  { %v1536_v60 = vrot.slane %v1534_v59, 6  ;;  %v3107_v46 = vsel %vm1014_vm6, %v1960_v37, %v1534_v59 }
0x214b   :  { %1537 = vrot.lane.b32.xlu0 %v1536_v60, %s2833_s23 }
0x21bd   :  { %v1538_v61 = vpop.permute.xlu0 %1537 }
0x21be   :  { %2420 = vmatmul.mubr.msk.f32.vlgmr.msra.gmra.mrb[16].mxu1 %vm167_vm3, %v1538_v61 }
0x21bf   :  { %2592 = vmatpush3.bf16.msra.mxu1 %v3027_v28  ;;  %2441 = vmatprep.mubr.msk.f32.mxu1 %vm2829_vm0, %v2830_v20 }
0x21c0   :  { %2593 = vmatprep.subr.bf16.mxu1 %v2828_v1 }
0x21c3   :  { %2595 = vmatpush3.bf16.msra.mxu1 %v3030_v30 }
0x2291   :  { %v1607_v62 = vpop.f32.mrb[16].mxu1 }
0x2292   :  { %v1611_v63 = vadd.f32 %v1607_v62, %v3056_v39  ;;  %v2421_v2 = vpop.f32.mrb[17].mxu1 }
0x2294   :  { %2719 = vtanh.f32 %v1611_v63  ;;  %v2113_v4 = vmul.f32 -1.442695, %v1611_v63 }
0x2296   :  { %2721 = vpow2.f32 %v2113_v4 }
0x229e   :  { %v2720_v3 = vpop.eup %2719 }
0x229f   :  { %1624 = vrot.lane.b32.xlu1 %v2720_v3, %s2832_s22 }
0x22a0   :  { %v2722_v5 = vpop.eup %2721 }
0x22a1   :  { %v1615_v6 = vadd.f32 1.0, %v2722_v5 }
0x22a3   :  { %2723 = vrcp.f32 %v1615_v6 }
0x22ad   :  { %v2724_v7 = vpop.eup %2723 }
0x22ae   :  { %v1622_v11 = vmul.f32 %v2724_v7, %v1620_v10 }
0x2311   :  { %v1625_v8 = vpop.permute.xlu1 %1624 }
0x2312   :  { %v1627_v9 = vmul.f32 %v2724_v7, %v1625_v8 }
0x2314   :  { %1629 = vrot.lane.b32.xlu0 %v1627_v9, %s2832_s22 }
0x2386   :  { %v1630_v12 = vpop.permute.xlu0 %1629 }
0x2387   :  { %v1632_v13 = vadd.f32 %v1630_v12, %v1622_v11 }
0x2389   :  { %2725 = vtanh.f32 %v1632_v13 }
0x2393   :  { %v2726_v14 = vpop.eup %2725 }
0x2394   :  { %1635 = vrot.lane.b32.xlu1 %v2726_v14, %s2832_s22  ;;  %v1966_v14 = vld [vmem:[#allocation5 + $0x8] sm:$0xff] }
0x2406   :  { %v1636_v16 = vpop.permute.xlu1 %1635 }
0x2407   :  { %v3120_v44 = vmul.f32 %v2724_v7, %v1636_v16  ;;  %v1967_v16 = vld [vmem:[#allocation5 + $0x10] sm:$0xff] }
0x2409   :  { %1640 = vrot.lane.b32.xlu0 %v3120_v44, %s2833_s23 }
0x247b   :  { %v1641_v17 = vpop.permute.xlu0 %1640 }
0x247c   :  { %2431 = vmatmul.mubr.msk.f32.vlgmr.msra.gmra.mrb[12].mxu0 %vm167_vm3, %v1641_v17  ;;  %v1968_v17 = vld [vmem:[#allocation5 + $0x18] sm:$0xff] }
0x247d   :  { %2598 = vmatpush3.bf16.msra.mxu0 %v3027_v28  ;;  %2452 = vmatprep.mubr.msk.f32.mxu0 %vm2829_vm0, %v2830_v20 }
0x247e   :  { %2599 = vmatprep.subr.bf16.mxu0 %v2828_v1  ;;  %v1726_v1 = vrot.slane %v1632_v13, 6  ;;  %v1965_v13 = vld [vmem:[#allocation5] sm:$0xff] }
0x2481   :  { %2601 = vmatpush3.bf16.msra.mxu0 %v3030_v30 }
0x254f   :  { %v1710_v18 = vpop.f32.mrb[12].mxu0 }
0x2550   :  { %v1715_v19 = vrot.slane %v1710_v18, 6  ;;  %v2432_v22 = vpop.f32.mrb[13].mxu0  ;;  %v2606_v18 = vpack.c.bf16 %v1968_v17, %v1967_v16 }
0x2552   :  { %v1717_v23 = vadd.f32 %v1715_v19, %v3056_v39 }
0x2554   :  { %2727 = vtanh.f32 %v1717_v23  ;;  %v2115_v25 = vmul.f32 -1.442695, %v1717_v23 }
0x2556   :  { %2729 = vpow2.f32 %v2115_v25  ;;  %v2120_v25 = vld [vmem:[%s3177_s4] ss:$0 sm:$0xff] }
0x255e   :  { %v2728_v24 = vpop.eup %2727 }
0x255f   :  { %1730 = vrot.lane.b32.xlu1 %v2728_v24, %s2832_s22 }
0x2560   :  { %v2730_v26 = vpop.eup %2729 }
0x2561   :  { %v1721_v28 = vadd.f32 1.0, %v2730_v26 }
0x2563   :  { %2731 = vrcp.f32 %v1721_v28 }
0x256d   :  { %v2732_v27 = vpop.eup %2731 }
0x256e   :  { %v1728_v30 = vmul.f32 %v2732_v27, %v1726_v1 }
0x25d1   :  { %v1731_v20 = vpop.permute.xlu1 %1730 }
0x25d2   :  { %v1733_v29 = vmul.f32 %v2732_v27, %v1731_v20 }
0x25d4   :  { %1735 = vrot.lane.b32.xlu0 %v1733_v29, %s2832_s22 }
0x2646   :  { %v1736_v15 = vpop.permute.xlu0 %1735 }
0x2647   :  { %v1738_v0 = vadd.f32 %v1736_v15, %v1728_v30 }
0x2649   :  { %2733 = vtanh.f32 %v1738_v0  ;;  %v1833_v50 = vrot.slane %v1738_v0, 6 }
0x2653   :  { %v2734_v31 = vpop.eup %2733 }
0x2654   :  { %1741 = vrot.lane.b32.xlu1 %v2734_v31, %s2832_s22 }
0x26c6   :  { %v1742_v32 = vpop.permute.xlu1 %1741 }
0x26c7   :  { %v1744_v33 = vmul.f32 %v2732_v27, %v1742_v32 }
0x26c9   :  { %v1746_v21 = vrot.slane %v1744_v33, 2  ;;  %v1962_v57 = vsel %vm1010_vm4, %v3120_v44, %v1744_v33  ;;  %v2602_v44 = vpack.c.bf16 %v1966_v14, %v1965_v13 }
0x26cb   :  { %1747 = vrot.lane.b32.xlu0 %v1746_v21, %s2833_s23  ;;  %2603 = vmatprep.subr.bf16.mxu1 %v2602_v44 }
0x273d   :  { %v1748_v34 = vpop.permute.xlu0 %1747 }
0x273e   :  { %2442 = vmatmul.mubr.msk.f32.vlgmr.msra.gmra.mrb[18].mxu1 %vm167_vm3, %v1748_v34 }
0x273f   :  { %2605 = vmatpush3.bf16.msra.mxu1 %v2602_v44 }
0x2740   :  { %2607 = vmatprep.subr.bf16.mxu1 %v2606_v18 }
0x2743   :  { %2609 = vmatpush3.bf16.msra.mxu1 %v2606_v18 }
0x2811   :  { %v1817_v35 = vpop.f32.mrb[18].mxu1 }
0x2812   :  { %v1822_v36 = vrot.slane %v1817_v35, 4  ;;  %v2443_v37 = vpop.f32.mrb[19].mxu1 }
0x2814   :  { %v1824_v38 = vadd.f32 %v1822_v36, %v3056_v39 }
0x2816   :  { %2735 = vtanh.f32 %v1824_v38  ;;  %v2117_v42 = vmul.f32 -1.442695, %v1824_v38 }
0x2818   :  { %2737 = vpow2.f32 %v2117_v42 }
0x2820   :  { %v2736_v40 = vpop.eup %2735 }
0x2821   :  { %1837 = vrot.lane.b32.xlu1 %v2736_v40, %s2832_s22 }
0x2822   :  { %v2738_v43 = vpop.eup %2737 }
0x2823   :  { %v1828_v45 = vadd.f32 1.0, %v2738_v43 }
0x2825   :  { %2739 = vrcp.f32 %v1828_v45 }
0x282f   :  { %v2740_v47 = vpop.eup %2739 }
0x2830   :  { %v1835_v51 = vmul.f32 %v2740_v47, %v1833_v50 }
0x2893   :  { %v1838_v48 = vpop.permute.xlu1 %1837 }
0x2894   :  { %v1840_v49 = vmul.f32 %v2740_v47, %v1838_v48 }
0x2896   :  { %1842 = vrot.lane.b32.xlu0 %v1840_v49, %s2832_s22 }
0x2908   :  { %v1843_v52 = vpop.permute.xlu0 %1842 }
0x2909   :  { %v1845_v53 = vadd.f32 %v1843_v52, %v1835_v51 }
0x290b   :  { %2741 = vtanh.f32 %v1845_v53  ;;  %v1940_v9 = vrot.slane %v1845_v53, 6 }
0x2915   :  { %v2742_v54 = vpop.eup %2741 }
0x2916   :  { %1848 = vrot.lane.b32.xlu1 %v2742_v54, %s2832_s22 }
0x2988   :  { %v1849_v55 = vpop.permute.xlu1 %1848 }
0x2989   :  { %v1851_v56 = vmul.f32 %v2740_v47, %v1849_v55 }
0x298b   :  { %v1853_v41 = vrot.slane %v1851_v56, 4  ;;  %v1963_v58 = vsel %vm1012_vm5, %v1962_v57, %v1851_v56 }
0x298d   :  { %1854 = vrot.lane.b32.xlu0 %v1853_v41, %s2833_s23 }
0x29ff   :  { %v1855_v59 = vpop.permute.xlu0 %1854 }
0x2a00   :  { %2453 = vmatmul.mubr.msk.f32.vlgmr.msra.gmra.mrb[14].mxu0 %vm167_vm3, %v1855_v59 }
0x2ad3   :  { %v1924_v60 = vpop.f32.mrb[14].mxu0 }
0x2ad4   :  { %v1929_v61 = vrot.slane %v1924_v60, 2  ;;  %v2454_v62 = vpop.f32.mrb[15].mxu0 }
0x2ad6   :  { %v1931_v63 = vadd.f32 %v1929_v61, %v3056_v39 }
0x2ad8   :  { %2743 = vtanh.f32 %v1931_v63  ;;  %v2119_v3 = vmul.f32 -1.442695, %v1931_v63 }
0x2ada   :  { %2745 = vpow2.f32 %v2119_v3 }
0x2ae2   :  { %v2744_v2 = vpop.eup %2743 }
0x2ae3   :  { %1944 = vrot.lane.b32.xlu1 %v2744_v2, %s2832_s22 }
0x2ae4   :  { %v2746_v4 = vpop.eup %2745 }
0x2ae5   :  { %v1935_v5 = vadd.f32 1.0, %v2746_v4 }
0x2ae7   :  { %2747 = vrcp.f32 %v1935_v5 }
0x2af1   :  { %v2748_v6 = vpop.eup %2747 }
0x2af2   :  { %v1942_v10 = vmul.f32 %v2748_v6, %v1940_v9 }
0x2b55   :  { %v1945_v7 = vpop.permute.xlu1 %1944 }
0x2b56   :  { %v1947_v8 = vmul.f32 %v2748_v6, %v1945_v7 }
0x2b58   :  { %1949 = vrot.lane.b32.xlu0 %v1947_v8, %s2832_s22 }
0x2b5c   :  { %1978 = vrot.lane.b32.xlu0 %v3107_v46, %s2833_s23 }
0x2bca   :  { %v1950_v39 = vpop.permute.xlu0 %1949 }
0x2bcb   :  { %v1952_v11 = vadd.f32 %v1950_v39, %v1942_v10 }
0x2bcd   :  { %2749 = vtanh.f32 %v1952_v11 }
0x2bce   :  { %v1979_v12 = vpop.permute.xlu0 %1978 }
0x2bcf   :  { %2463 = vmatprep.mubr.msk.f32.mxu1 %vm167_vm3, %v1979_v12 }
0x2bd7   :  { %v2750_v19 = vpop.eup %2749 }
0x2bd8   :  { %1955 = vrot.lane.b32.xlu1 %v2750_v19, %s2832_s22 }
0x2c4a   :  { %v1956_v46 = vpop.permute.xlu1 %1955 }
0x2c4b   :  { %v1958_v22 = vmul.f32 %v2748_v6, %v1956_v46 }
0x2c4d   :  { %v1964_v23 = vsel %vm1014_vm6, %v1963_v58, %v1958_v22 }
0x2c4e   :  { %1980 = vrot.lane.b32.xlu1 %v1964_v23, %s2833_s23 }
0x2cc0   :  { %v1981_v24 = vpop.permute.xlu1 %1980 }
0x2cc1   :  { %2464 = vmatmul.mubr.msk.f32.vlgmr.msra.gmra.mrb[20].mxu1 %vm167_vm3, %v1981_v24 }
0x2d94   :  { %v2465_v26 = vpop.f32.mrb[20].mxu1 }
0x2d95   :  { %v2058_v28 = vadd.f32 %v2465_v26, %v2120_v25  ;;  %v2052_v27 = vpop.f32.mrb[21].mxu1 }
0x2d96   :  { %v2053_v20 = vadd.f32 %v2120_v25, %v2052_v27 }
0x2d97   :  { %2062 = vst [vmem:[#allocation7 + $0x8] sm:$0xff] %v2058_v28 }
0x2d98   :  { %2061 = vst [vmem:[#allocation7] sm:$0xff] %v2053_v20 }
0x2d99   :  { %2806 = shalt.err (!%p2803_p6)
}
0x2d9a   :  { %s2807_s4 = scalar_lea.hbm %s3178_s5, 256 }
0x2d9b   :  { %p2808_p7 = scmp.ne.s32.totalorder %s3178_s5, %s2807_s4  ;;  %p2811_p8 = scmp.lt.u32.totalorder %s2807_s4, %s3178_s5 }
0x2d9d   :  { %p2813_p9 = pnand %p2811_p8, %p2808_p7 }
0x2d9f   :  { %2816 = shalt.err (!%p2813_p9)
}
0x2da0   :  { %2074 = dma.vmem_to_hbm [thread:$0]  %s2069_s30, 256, %s3178_s5, [#allocation4], %s2824_s28, %s2824_s28, %s2825_s29  }
0x2da1   :  { %2821 = dma.done.wait [#allocation4], 256  }
0x2da2   :  { %2822 = vsyncadd [#allocation4], 4294967040 }
0x2da3   :  { %2078 = vsyncpa [#allocation3], 1 }
0x2da4   :  { %2079 = vsyncpa [#allocation6], 1 }
0x2da5   :  { %2080 = vsyncpa [#allocation4], 1 }

</bundles_post_ra>
